<compile_context>
chip_gen: v6e
topology: v6e:2x2x1
jax: 0.10.0
libtpu: 0.0.40
codegen_flags: <defaults>
</compile_context>

<pallas_src>
import functools

import numpy as np
import jax
import jax.numpy as jnp
from jax import lax
from jax.experimental import pallas as pl
from jax.experimental.pallas import tpu as pltpu

C_IN, C1, C2, KSZ = 2, 10, 20, 3


def _round_up(x, m):
    return ((x + m - 1) // m) * m


# --------------------------------------------------------------------------
# Fused kernel: x -> conv1(+ReLU) -> conv2(+ReLU) -> [pi | tanh(value)]
# Three lane-dense MXU dots (bf16 operands, f32 accumulation); one output DMA.
# --------------------------------------------------------------------------
def _net2_kernel(A, x_ref, m1_ref, b1_ref, m2_ref, b2_ref, wh_ref, bh_ref,
                 out_ref):
    x = x_ref[...].astype(jnp.bfloat16)                          # (TM, 128)
    h1 = jnp.dot(x, m1_ref[...], preferred_element_type=jnp.float32) + b1_ref[...]
    h1 = jnp.maximum(h1, 0.0).astype(jnp.bfloat16)               # (TM, 512)
    h2 = jnp.dot(h1, m2_ref[...], preferred_element_type=jnp.float32) + b2_ref[...]
    h2 = jnp.maximum(h2, 0.0).astype(jnp.bfloat16)               # (TM, 896)
    out = jnp.dot(h2, wh_ref[...], preferred_element_type=jnp.float32) + bh_ref[...]
    # tanh only on the value column (lane A); pi lanes 0..A-1 pass through.
    col = lax.broadcasted_iota(jnp.int32, out.shape, 1)
    out_ref[...] = jnp.where(col == A, jnp.tanh(out), out)       # (TM, 128)


# --------------------------------------------------------------------------
# One-time host-side weight folding (3x3 same conv over fixed HxL -> dense mat)
# --------------------------------------------------------------------------
def _conv3x3_same_as_matrix(w_oihw, H, L):
    """Fold a 3x3 stride-1 pad-1 Conv2d into a dense (Cin*H*L, Cout*H*L) matrix
    acting on NCHW-flattened vectors.  Host-side, runs once at setup."""
    w = np.asarray(w_oihw, np.float32)                           # (Cout, Cin, 3, 3)
    Cout, Cin, K, _ = w.shape
    HL = H * L
    M = np.zeros((Cin * HL, Cout * HL), np.float32)
    ci_off = np.arange(Cin) * HL
    co_off = np.arange(Cout) * HL
    for ky in range(K):
        for kx in range(K):
            wk = w[:, :, ky, kx].T                               # (Cin, Cout)
            for oh in range(H):
                ih = oh + ky - 1
                if not 0 <= ih < H:
                    continue
                for ow in range(L):
                    iw = ow + kx - 1
                    if not 0 <= iw < L:
                        continue
                    rows = ci_off + ih * L + iw
                    cols = co_off + oh * L + ow
                    M[np.ix_(rows, cols)] += wk
    return M


def _pad2d(a, rows, cols):
    a = np.asarray(a, np.float32)
    out = np.zeros((rows, cols), np.float32)
    out[:a.shape[0], :a.shape[1]] = a
    return out


def prepare_params(params, *, height, length, action_size):
    """One-time transform of PyTorch-layout params into padded, bf16,
    kernel-ready matrices (padding lanes/rows are exactly zero)."""
    H, L, A = height, length, action_size
    HL = H * L
    K1, N1, N2, NH = C_IN * HL, C1 * HL, C2 * HL, A + 1
    K1P, N1P, N2P, NHP = (_round_up(d, 128) for d in (K1, N1, N2, NH))

    m1 = _conv3x3_same_as_matrix(params["conv1_w"], H, L)        # (84, 420)
    m2 = _conv3x3_same_as_matrix(params["conv2_w"], H, L)        # (420, 840)
    b1 = np.repeat(np.asarray(params["conv1_b"], np.float32), HL)[None, :]
    b2 = np.repeat(np.asarray(params["conv2_b"], np.float32), HL)[None, :]
    wh = np.concatenate([np.asarray(params["pi_w"], np.float32).T,
                         np.asarray(params["value_w"], np.float32).T], axis=1)
    bh = np.concatenate([np.asarray(params["pi_b"], np.float32),
                         np.asarray(params["value_b"], np.float32)])[None, :]

    return {
        "m1": jnp.asarray(_pad2d(m1, K1P, N1P), jnp.bfloat16),   # (128, 512)
        "b1": jnp.asarray(_pad2d(b1, 1, N1P), jnp.float32),      # (1, 512)
        "m2": jnp.asarray(_pad2d(m2, N1P, N2P), jnp.bfloat16),   # (512, 896)
        "b2": jnp.asarray(_pad2d(b2, 1, N2P), jnp.float32),      # (1, 896)
        "wh": jnp.asarray(_pad2d(wh, N2P, NHP), jnp.bfloat16),   # (896, 128)
        "bh": jnp.asarray(_pad2d(bh, 1, NHP), jnp.float32),      # (1, 128)
    }


# --------------------------------------------------------------------------
# Forward wrapper: one pallas_call, batch grid with resident weights.
# --------------------------------------------------------------------------
def net2_forward(board, prepped, *, height, length, action_size, batch_tile=None):
    H, L, A = height, length, action_size
    K1 = C_IN * H * L
    x = board.reshape(-1, K1).astype(jnp.float32)                # NCHW flatten
    B = x.shape[0]

    K1P = prepped["m1"].shape[0]
    NHP = prepped["wh"].shape[1]

    # Batch tile: 256 rows for large batches (v6e/v7x MXU is 256-tall;
    # use batch_tile=128 on v5e), tiny padded tile for small batches.
    if batch_tile is None:
        batch_tile = 256 if B >= 256 else _round_up(max(B, 1), 8)
    TM = batch_tile
    B_pad = _round_up(B, TM)

    x_p = jnp.zeros((B_pad, K1P), jnp.float32).at[:B, :K1].set(x)

    # Weights/biases: constant block index -> DMA'd once, resident across steps.
    def weight_spec(arr):
        return pl.BlockSpec(arr.shape, lambda i: (0, 0))

    n1p = prepped["m1"].shape[1]
    n2p = prepped["m2"].shape[1]
    flops = 2 * B_pad * (K1P * n1p + n1p * n2p + n2p * NHP)
    bytes_accessed = (x_p.size * 4 + B_pad * NHP * 4
                      + sum(int(prepped[k].size) * 2 for k in ("m1", "m2", "wh"))
                      + sum(int(prepped[k].size) * 4 for k in ("b1", "b2", "bh")))

    out = pl.pallas_call(
        functools.partial(_net2_kernel, A),
        grid=(B_pad // TM,),
        out_shape=jax.ShapeDtypeStruct((B_pad, NHP), jnp.float32),
        in_specs=[
            pl.BlockSpec((TM, K1P), lambda i: (i, 0)),           # x tile
            weight_spec(prepped["m1"]),
            weight_spec(prepped["b1"]),
            weight_spec(prepped["m2"]),
            weight_spec(prepped["b2"]),
            weight_spec(prepped["wh"]),
            weight_spec(prepped["bh"]),
        ],
        out_specs=pl.BlockSpec((TM, NHP), lambda i: (i, 0)),
        compiler_params=pltpu.CompilerParams(
            dimension_semantics=("parallel",)),                  # 2 TCs on v7x
        cost_estimate=pl.CostEstimate(flops=flops, transcendentals=B_pad,
                                      bytes_accessed=bytes_accessed),
    )(x_p, prepped["m1"], prepped["b1"], prepped["m2"], prepped["b2"],
      prepped["wh"], prepped["bh"])

    pi = out[:B, :A]
    v = out[:B, A:A + 1]
    return pi, v


# --------------------------------------------------------------------------
# Deterministic parameter init (PyTorch shapes: OIHW convs, (out,in) linears)
# --------------------------------------------------------------------------
def init_params(key, H, L, A):
    ks = jax.random.split(key, 8)
    F = C2 * H * L

    def u(k, shape, fan_in):
        bound = 1.0 / (fan_in ** 0.5)
        return jax.random.uniform(k, shape, jnp.float32, -bound, bound)

    return {
        "conv1_w": u(ks[0], (C1, C_IN, KSZ, KSZ), C_IN * KSZ * KSZ),
        "conv1_b": u(ks[1], (C1,), C_IN * KSZ * KSZ),
        "conv2_w": u(ks[2], (C2, C1, KSZ, KSZ), C1 * KSZ * KSZ),
        "conv2_b": u(ks[3], (C2,), C1 * KSZ * KSZ),
        "pi_w": u(ks[4], (A, F), F),
        "pi_b": u(ks[5], (A,), F),
        "value_w": u(ks[6], (1, F), F),
        "value_b": u(ks[7], (1,), F),
    }


# --------------------------------------------------------------------------
# Pure-JAX reference (matches PyTorch forward semantics) for verification.
# --------------------------------------------------------------------------
def net2_reference(board, params, *, height, length, action_size):
    H, L = height, length
    x = board.reshape(-1, C_IN, H, L).astype(jnp.float32)

    def conv(inp, w, b):
        y = jax.lax.conv_general_dilated(
            inp, w, window_strides=(1, 1), padding=((1, 1), (1, 1)),
            dimension_numbers=("NCHW", "OIHW", "NCHW"))
        return jax.nn.relu(y + b[None, :, None, None])

    h = conv(conv(x, params["conv1_w"], params["conv1_b"]),
             params["conv2_w"], params["conv2_b"])
    f = h.reshape(x.shape[0], -1)
    pi = f @ params["pi_w"].T + params["pi_b"]
    v = jnp.tanh(f @ params["value_w"].T + params["value_b"])
    return pi, v


if __name__ == "__main__":
    H, L, A = 6, 7, 7        # game.height, game.length, len(action_possible)
    key = jax.random.PRNGKey(0)
    kp, kx1, kx2 = jax.random.split(key, 3)
    params = init_params(kp, H, L, A)
    prepped = prepare_params(params, height=H, length=L, action_size=A)

    # bf16 weights -> loosened tolerance vs. the f32 reference.
    TOL = 5e-2

    # Small batch (single grid step, padded to 8 rows).
    board = jax.random.normal(kx1, (2, C_IN, H, L), jnp.float32)
    pi, v = net2_forward(board, prepped, height=H, length=L, action_size=A)
    jax.block_until_ready((pi, v))
    pi_ref, v_ref = net2_reference(board, params, height=H, length=L,
                                   action_size=A)
    assert pi.shape == (2, A) and v.shape == (2, 1)
    assert jnp.allclose(pi, pi_ref, atol=TOL, rtol=TOL), \
        float(jnp.max(jnp.abs(pi - pi_ref)))
    assert jnp.allclose(v, v_ref, atol=TOL, rtol=TOL), \
        float(jnp.max(jnp.abs(v - v_ref)))

    # Larger batch exercising the batch grid (300 -> two 256-row tiles).
    board2 = jax.random.normal(kx2, (300, C_IN, H, L), jnp.float32)
    pi2, v2 = net2_forward(board2, prepped, height=H, length=L, action_size=A)
    jax.block_until_ready((pi2, v2))
    pi2_ref, v2_ref = net2_reference(board2, params, height=H, length=L,
                                     action_size=A)
    assert pi2.shape == (300, A) and v2.shape == (300, 1)
    assert jnp.allclose(pi2, pi2_ref, atol=TOL, rtol=TOL), \
        float(jnp.max(jnp.abs(pi2 - pi2_ref)))
    assert jnp.allclose(v2, v2_ref, atol=TOL, rtol=TOL), \
        float(jnp.max(jnp.abs(v2 - v2_ref)))

    print("KERNEL_OK")
</pallas_src>

<mosaic_0001>
module attributes {stable_mosaic.version = 11 : i64} {
  func.func @_net2_kernel(%arg0: i32, %arg1: memref<8x128xf32, #tpu.memory_space<vmem>>, %arg2: memref<128x512xbf16, #tpu.memory_space<vmem>>, %arg3: memref<1x512xf32, #tpu.memory_space<vmem>>, %arg4: memref<512x896xbf16, #tpu.memory_space<vmem>>, %arg5: memref<1x896xf32, #tpu.memory_space<vmem>>, %arg6: memref<896x128xbf16, #tpu.memory_space<vmem>>, %arg7: memref<1x128xf32, #tpu.memory_space<vmem>>, %arg8: memref<8x128xf32, #tpu.memory_space<vmem>>) attributes {dimension_semantics = [#tpu.dimension_semantics<parallel>], iteration_bounds = array<i64: 1>, scalar_prefetch = 0 : i64, scratch_operands = 0 : i64, tpu.core_type = #tpu.core_type<tc>, window_params = [{transform_indices = @transform_0, window_bounds = array<i64: 8, 128>}, {pipeline_mode = #tpu.pipeline_mode<synchronous>, transform_indices = @transform_1, window_bounds = array<i64: 128, 512>}, {pipeline_mode = #tpu.pipeline_mode<synchronous>, transform_indices = @transform_2, window_bounds = array<i64: 1, 512>}, {pipeline_mode = #tpu.pipeline_mode<synchronous>, transform_indices = @transform_3, window_bounds = array<i64: 512, 896>}, {pipeline_mode = #tpu.pipeline_mode<synchronous>, transform_indices = @transform_4, window_bounds = array<i64: 1, 896>}, {pipeline_mode = #tpu.pipeline_mode<synchronous>, transform_indices = @transform_5, window_bounds = array<i64: 896, 128>}, {pipeline_mode = #tpu.pipeline_mode<synchronous>, transform_indices = @transform_6, window_bounds = array<i64: 1, 128>}, {transform_indices = @transform_7, window_bounds = array<i64: 8, 128>}]} {
    %c0 = arith.constant 0 : index
    %c0_0 = arith.constant 0 : index
    %0 = vector.load %arg1[%c0, %c0_0] : memref<8x128xf32, #tpu.memory_space<vmem>>, vector<8x128xf32>
    %1 = arith.truncf %0 : vector<8x128xf32> to vector<8x128xbf16>
    %c0_1 = arith.constant 0 : index
    %c0_2 = arith.constant 0 : index
    %2 = vector.load %arg2[%c0_1, %c0_2] : memref<128x512xbf16, #tpu.memory_space<vmem>>, vector<128x512xbf16>
    %cst = arith.constant dense<0.000000e+00> : vector<8x512xf32>
    %3 = tpu.matmul %1, %2, %cst {dimension_numbers = #tpu.dot_dimension_numbers<[1], [0], [0], [1], [0, 0, 1, 1], [], []>} : vector<8x128xbf16>, vector<128x512xbf16>, vector<8x512xf32> -> vector<8x512xf32>
    %c0_3 = arith.constant 0 : index
    %c0_4 = arith.constant 0 : index
    %4 = vector.load %arg3[%c0_3, %c0_4] : memref<1x512xf32, #tpu.memory_space<vmem>>, vector<1x512xf32>
    %5 = vector.broadcast %4 : vector<1x512xf32> to vector<8x512xf32>
    %6 = arith.addf %3, %5 : vector<8x512xf32>
    %cst_5 = arith.constant 0.000000e+00 : f32
    %7 = vector.broadcast %cst_5 : f32 to vector<8x512xf32>
    %8 = arith.maximumf %6, %7 : vector<8x512xf32>
    %9 = arith.truncf %8 : vector<8x512xf32> to vector<8x512xbf16>
    %c0_6 = arith.constant 0 : index
    %c0_7 = arith.constant 0 : index
    %10 = vector.load %arg4[%c0_6, %c0_7] : memref<512x896xbf16, #tpu.memory_space<vmem>>, vector<512x896xbf16>
    %cst_8 = arith.constant dense<0.000000e+00> : vector<8x896xf32>
    %11 = tpu.matmul %9, %10, %cst_8 {dimension_numbers = #tpu.dot_dimension_numbers<[1], [0], [0], [1], [0, 0, 1, 1], [], []>} : vector<8x512xbf16>, vector<512x896xbf16>, vector<8x896xf32> -> vector<8x896xf32>
    %c0_9 = arith.constant 0 : index
    %c0_10 = arith.constant 0 : index
    %12 = vector.load %arg5[%c0_9, %c0_10] : memref<1x896xf32, #tpu.memory_space<vmem>>, vector<1x896xf32>
    %13 = vector.broadcast %12 : vector<1x896xf32> to vector<8x896xf32>
    %14 = arith.addf %11, %13 : vector<8x896xf32>
    %cst_11 = arith.constant 0.000000e+00 : f32
    %15 = vector.broadcast %cst_11 : f32 to vector<8x896xf32>
    %16 = arith.maximumf %14, %15 : vector<8x896xf32>
    %17 = arith.truncf %16 : vector<8x896xf32> to vector<8x896xbf16>
    %c0_12 = arith.constant 0 : index
    %c0_13 = arith.constant 0 : index
    %18 = vector.load %arg6[%c0_12, %c0_13] : memref<896x128xbf16, #tpu.memory_space<vmem>>, vector<896x128xbf16>
    %cst_14 = arith.constant dense<0.000000e+00> : vector<8x128xf32>
    %19 = tpu.matmul %17, %18, %cst_14 {dimension_numbers = #tpu.dot_dimension_numbers<[1], [0], [0], [1], [0, 0, 1, 1], [], []>} : vector<8x896xbf16>, vector<896x128xbf16>, vector<8x128xf32> -> vector<8x128xf32>
    %c0_15 = arith.constant 0 : index
    %c0_16 = arith.constant 0 : index
    %20 = vector.load %arg7[%c0_15, %c0_16] : memref<1x128xf32, #tpu.memory_space<vmem>>, vector<1x128xf32>
    %21 = vector.broadcast %20 : vector<1x128xf32> to vector<8x128xf32>
    %22 = arith.addf %19, %21 : vector<8x128xf32>
    %23 = tpu.iota {dimensions = array<i32: 1>} : vector<8x128xi32>
    %c7_i32 = arith.constant 7 : i32
    %24 = vector.broadcast %c7_i32 : i32 to vector<8x128xi32>
    %25 = arith.cmpi eq, %23, %24 : vector<8x128xi32>
    %26 = math.tanh %22 : vector<8x128xf32>
    %27 = arith.select %25, %26, %22 : vector<8x128xi1>, vector<8x128xf32>
    %c0_17 = arith.constant 0 : index
    %c0_18 = arith.constant 0 : index
    %28 = vector.load %arg8[%c0_17, %c0_18] : memref<8x128xf32, #tpu.memory_space<vmem>>, vector<8x128xf32>
    tpu.vector_store %arg8[%c0_17, %c0_18], %27 {strides = array<i32>} : memref<8x128xf32, #tpu.memory_space<vmem>>, vector<8x128xf32>,
    return
  }
  func.func @transform_0(%arg0: i32) -> (i32, i32) {
    %c0_i32 = arith.constant 0 : i32
    %c0_i32_0 = arith.constant 0 : i32
    return %arg0, %c0_i32 : i32, i32
  }
  func.func @transform_1(%arg0: i32) -> (i32, i32) {
    %c0_i32 = arith.constant 0 : i32
    %c0_i32_0 = arith.constant 0 : i32
    %c0_i32_1 = arith.constant 0 : i32
    return %c0_i32, %c0_i32_0 : i32, i32
  }
  func.func @transform_2(%arg0: i32) -> (i32, i32) {
    %c0_i32 = arith.constant 0 : i32
    %c0_i32_0 = arith.constant 0 : i32
    %c0_i32_1 = arith.constant 0 : i32
    return %c0_i32, %c0_i32_0 : i32, i32
  }
  func.func @transform_3(%arg0: i32) -> (i32, i32) {
    %c0_i32 = arith.constant 0 : i32
    %c0_i32_0 = arith.constant 0 : i32
    %c0_i32_1 = arith.constant 0 : i32
    return %c0_i32, %c0_i32_0 : i32, i32
  }
  func.func @transform_4(%arg0: i32) -> (i32, i32) {
    %c0_i32 = arith.constant 0 : i32
    %c0_i32_0 = arith.constant 0 : i32
    %c0_i32_1 = arith.constant 0 : i32
    return %c0_i32, %c0_i32_0 : i32, i32
  }
  func.func @transform_5(%arg0: i32) -> (i32, i32) {
    %c0_i32 = arith.constant 0 : i32
    %c0_i32_0 = arith.constant 0 : i32
    %c0_i32_1 = arith.constant 0 : i32
    return %c0_i32, %c0_i32_0 : i32, i32
  }
  func.func @transform_6(%arg0: i32) -> (i32, i32) {
    %c0_i32 = arith.constant 0 : i32
    %c0_i32_0 = arith.constant 0 : i32
    %c0_i32_1 = arith.constant 0 : i32
    return %c0_i32, %c0_i32_0 : i32, i32
  }
  func.func @transform_7(%arg0: i32) -> (i32, i32) {
    %c0_i32 = arith.constant 0 : i32
    %c0_i32_0 = arith.constant 0 : i32
    return %arg0, %c0_i32 : i32, i32
  }
}

</mosaic_0001>

<bundles_post_ra>
// kernel: tpu_custom_call.1
= control target key start
LH: loop header
LB: loop body
LE: loop exit
PB: predicated region body
PF: predicated region fallthrough
CT: control target
= control target key end

     0   :  { %12 = vsyncpa [#allocation3], 0  ;;  %s3990_s0 = inlined_call_operand.hbm [shape: f32[8,128], index: 0, kind: input, shape index: {}]   ;;  %s3991_s1 = inlined_call_operand.hbm [shape: bf16[128,512], index: 1, kind: input, shape index: {}]   ;;  %s3992_s2 = inlined_call_operand.hbm [shape: f32[1,512], index: 2, kind: input, shape index: {}]   ;;  %s3993_s3 = inlined_call_operand.hbm [shape: bf16[512,896], index: 3, kind: input, shape index: {}]   ;;  %s3994_s4 = inlined_call_operand.vmem [shape: f32[1,896], index: 4, kind: input, shape index: {}]   ;;  %s3995_s5 = inlined_call_operand.hbm [shape: bf16[896,128], index: 5, kind: input, shape index: {}]   ;;  %s3996_s6 = inlined_call_operand.vmem [shape: f32[1,128], index: 6, kind: input, shape index: {}]   ;;  %s3997_s7 = inlined_call_operand.hbm [shape: f32[8,128], index: 7, kind: output, shape index: {}]  }
   0x1   :  { %13 = vsyncpa [#allocation6], 0 }
   0x2   :  { %14 = vsyncpa [#allocation9], 0 }
   0x3   :  { %15 = vsyncpa [#allocation4], 0  ;;  %s3842_s24 = smov [#allocation5]  }
   0x4   :  { %s31_s25 = sshll.u32 %s3842_s24, 4  ;;  %s32_s25 = int_to_ptr.vmem [resolvable:$true] %s31_s25 }
   0x5   :  { %s3722_s26 = scalar_lea.vmem %s32_s25, 4096  ;;  %p3727_p1 = scmp.lt.s32.totalorder %s32_s25, %s32_s25 }
   0x6   :  { %p3723_p0 = scmp.ne.s32.totalorder %s32_s25, %s3722_s26  ;;  %p3728_p2 = scmp.lt.s32.totalorder %s3722_s26, %s3722_s26 }
   0x8   :  { %p3729_p3 = por %p3728_p2, %p3727_p1 }
   0xa   :  { %p3730_p4 = pnand %p3729_p3, %p3723_p0 }
   0xc   :  { %3733 = shalt.err (!%p3730_p4)
}
   0xd   :  { %s3843_s27 = smov 256   ;;  %s3844_s28 = smov 16  }
   0xe   :  { %37 = dma.hbm_to_vmem [thread:$0]  %s3991_s1, 4096, %s32_s25, [#allocation6], %s3843_s27, %s3843_s27, %s3844_s28  }
   0xf   :  { %s3845_s8 = smov [#allocation8]  }
  0x10   :  { %s53_s9 = sshll.u32 %s3845_s8, 4  ;;  %s54_s9 = int_to_ptr.vmem [resolvable:$true] %s53_s9 }
  0x11   :  { %s3742_s10 = scalar_lea.vmem %s54_s9, 28672  ;;  %p3747_p6 = scmp.lt.s32.totalorder %s54_s9, %s54_s9 }
  0x12   :  { %p3743_p5 = scmp.ne.s32.totalorder %s54_s9, %s3742_s10  ;;  %p3748_p7 = scmp.lt.s32.totalorder %s3742_s10, %s3742_s10 }
  0x14   :  { %p3749_p8 = por %p3748_p7, %p3747_p6 }
  0x16   :  { %p3750_p9 = pnand %p3749_p8, %p3743_p5 }
  0x18   :  { %3753 = shalt.err (!%p3750_p9)
}
  0x19   :  { %s3846_s11 = smov 448   ;;  %s3847_s12 = smov 28  }
  0x1a   :  { %59 = dma.hbm_to_vmem [thread:$0]  %s3993_s3, 28672, %s54_s9, [#allocation9], %s3846_s11, %s3846_s11, %s3847_s12  }
  0x1b   :  { %s3848_s15 = smov [#allocation2]   ;;  %s3849_s17 = smov [#allocation7]  }
  0x1c   :  { %s22_s16 = sshll.u32 %s3848_s15, 4  ;;  %s44_s1 = sshll.u32 %s3849_s17, 4  ;;  %s23_s16 = int_to_ptr.vmem [resolvable:$true] %s22_s16  ;;  %s45_s1 = int_to_ptr.vmem [resolvable:$true] %s44_s1 }
  0x1d   :  { %s3762_s18 = scalar_lea.vmem %s23_s16, 128  ;;  %p3767_p11 = scmp.lt.s32.totalorder %s23_s16, %s23_s16 }
  0x1e   :  { %p3763_p10 = scmp.ne.s32.totalorder %s23_s16, %s3762_s18  ;;  %p3768_p12 = scmp.lt.s32.totalorder %s3762_s18, %s3762_s18 }
  0x20   :  { %p3769_p13 = por %p3768_p12, %p3767_p11 }
  0x22   :  { %p3770_p0 = pnand %p3769_p13, %p3763_p10 }
  0x24   :  { %3773 = shalt.err (!%p3770_p0)
}
  0x25   :  { %25 = dma.hbm_to_vmem [thread:$0]  %s3990_s0, 128, %s23_s16, [#allocation3]  }
  0x26   :  { %s3782_s21 = scalar_lea.vmem %s45_s1, 64  ;;  %p3787_p2 = scmp.lt.s32.totalorder %s45_s1, %s45_s1 }
  0x27   :  { %p3783_p1 = scmp.ne.s32.totalorder %s45_s1, %s3782_s21  ;;  %p3788_p3 = scmp.lt.s32.totalorder %s3782_s21, %s3782_s21 }
  0x29   :  { %p3789_p4 = por %p3788_p3, %p3787_p2 }
  0x2b   :  { %p3790_p5 = pnand %p3789_p4, %p3783_p1 }
  0x2d   :  { %3793 = shalt.err (!%p3790_p5)
}
  0x2e   :  { %47 = dma.hbm_to_vmem [thread:$0]  %s3992_s2, 64, %s45_s1, [#allocation6]  }
  0x2f   :  { %s3850_s23 = smov [#allocation10]  }
  0x30   :  { %s67_s24 = sshll.u32 %s3850_s23, 4  ;;  %s68_s24 = int_to_ptr.vmem [resolvable:$true] %s67_s24 }
  0x31   :  { %s3802_s25 = scalar_lea.vmem %s68_s24, 7168  ;;  %p3807_p7 = scmp.lt.s32.totalorder %s68_s24, %s68_s24 }
  0x32   :  { %p3803_p6 = scmp.ne.s32.totalorder %s68_s24, %s3802_s25  ;;  %p3808_p8 = scmp.lt.s32.totalorder %s3802_s25, %s3802_s25 }
  0x34   :  { %p3809_p9 = por %p3808_p8, %p3807_p7 }
  0x36   :  { %p3810_p10 = pnand %p3809_p9, %p3803_p6 }
  0x38   :  { %3813 = shalt.err (!%p3810_p10)
}
  0x39   :  { %s3851_s0 = smov 64   ;;  %s3852_s26 = smov 4  }
  0x3a   :  { %73 = dma.hbm_to_vmem [thread:$0]  %s3995_s5, 7168, %s68_s24, [#allocation9], %s3851_s0, %s3851_s0, %s3852_s26  }
  0x3b   :  { %3834 = dma.done.wait [#allocation3], 128  }
  0x3c   :  { %3835 = vsyncadd [#allocation3], 4294967168 }
  0x3d   :  { %3836 = dma.done.wait [#allocation6], 4160  }
  0x3e   :  { %3837 = vsyncadd [#allocation6], 4294963136 }
  0x3f   :  { %3838 = dma.done.wait [#allocation9], 35840  }
  0x40   :  { %3839 = vsyncadd [#allocation9], 4294931456  ;;  %v3853_v0 = vmov 0   ;;  %v3288_v1 = vld [vmem:[#allocation5 + $0xe4] ss:$16 sps:$4 sm:$0xff]   ;;  %v92_v33 = vld [vmem:[#allocation2] sm:$0xff] }
  0x41   :  { %340 = vmatprep.mubr.bf16.mxu0 %v3853_v0  ;;  %381 = vmatprep.mubr.bf16.mxu1 %v3853_v0  ;;  %v3290_v2 = vld [vmem:[#allocation5 + $0xec] ss:$16 sps:$4 sm:$0xff]   ;;  %v3292_v3 = vld [vmem:[#allocation5 + $0xe0] ss:$16 sps:$4 sm:$0xff]   ;;  %v3293_v4 = vld [vmem:[#allocation5 + $0xe8] ss:$16 sps:$4 sm:$0xff]   ;;  %v93_v36 = vpack.c.bf16 %v92_v33, %v92_v33 }
  0x42   :  { %308 = vmatprep.subr.bf16.mxu0 %v3288_v1  ;;  %349 = vmatprep.subr.bf16.mxu1 %v3290_v2  ;;  %v3294_v5 = vld [vmem:[#allocation5 + $0xc4] ss:$16 sps:$4 sm:$0xff]   ;;  %v3296_v6 = vld [vmem:[#allocation5 + $0xcc] ss:$16 sps:$4 sm:$0xff]   ;;  %v3298_v7 = vld [vmem:[#allocation5 + $0xc0] ss:$16 sps:$4 sm:$0xff]  }
  0x43   :  { %309 = vmatpush1.bf16.msra.mxu0 %v3292_v3  ;;  %350 = vmatpush1.bf16.msra.mxu1 %v3293_v4  ;;  %v3299_v8 = vld [vmem:[#allocation5 + $0xc8] ss:$16 sps:$4 sm:$0xff]   ;;  %v3300_v9 = vld [vmem:[#allocation5 + $0xa4] ss:$16 sps:$4 sm:$0xff]   ;;  %v3302_v10 = vld [vmem:[#allocation5 + $0xac] ss:$16 sps:$4 sm:$0xff]  }
  0x44   :  { %310 = vmatprep.subr.bf16.mxu0 %v3294_v5  ;;  %351 = vmatprep.subr.bf16.mxu1 %v3296_v6  ;;  %v3304_v11 = vld [vmem:[#allocation5 + $0xa0] ss:$16 sps:$4 sm:$0xff]   ;;  %v3305_v12 = vld [vmem:[#allocation5 + $0xa8] ss:$16 sps:$4 sm:$0xff]   ;;  %v3306_v13 = vld [vmem:[#allocation5 + $0x84] ss:$16 sps:$4 sm:$0xff]  }
  0x45   :  { %v3308_v14 = vld [vmem:[#allocation5 + $0x8c] ss:$16 sps:$4 sm:$0xff]   ;;  %v3310_v15 = vld [vmem:[#allocation5 + $0x80] ss:$16 sps:$4 sm:$0xff]   ;;  %v3311_v16 = vld [vmem:[#allocation5 + $0x88] ss:$16 sps:$4 sm:$0xff]  }
  0x46   :  { %v3312_v17 = vld [vmem:[#allocation5 + $0x64] ss:$16 sps:$4 sm:$0xff]   ;;  %v3314_v18 = vld [vmem:[#allocation5 + $0x6c] ss:$16 sps:$4 sm:$0xff]   ;;  %v3316_v19 = vld [vmem:[#allocation5 + $0x60] ss:$16 sps:$4 sm:$0xff]  }
  0x47   :  { %311 = vmatpush1.bf16.msra.mxu0 %v3298_v7  ;;  %352 = vmatpush1.bf16.msra.mxu1 %v3299_v8  ;;  %v3317_v20 = vld [vmem:[#allocation5 + $0x68] ss:$16 sps:$4 sm:$0xff]   ;;  %v3318_v21 = vld [vmem:[#allocation5 + $0x44] ss:$16 sps:$4 sm:$0xff]   ;;  %v3320_v22 = vld [vmem:[#allocation5 + $0x4c] ss:$16 sps:$4 sm:$0xff]  }
  0x48   :  { %312 = vmatprep.subr.bf16.mxu0 %v3300_v9  ;;  %353 = vmatprep.subr.bf16.mxu1 %v3302_v10  ;;  %v3322_v23 = vld [vmem:[#allocation5 + $0x40] ss:$16 sps:$4 sm:$0xff]   ;;  %v3323_v24 = vld [vmem:[#allocation5 + $0x48] ss:$16 sps:$4 sm:$0xff]   ;;  %v3324_v25 = vld [vmem:[#allocation5 + $0x24] ss:$16 sps:$4 sm:$0xff]  }
  0x49   :  { %v3326_v26 = vld [vmem:[#allocation5 + $0x2c] ss:$16 sps:$4 sm:$0xff]   ;;  %v3328_v27 = vld [vmem:[#allocation5 + $0x20] ss:$16 sps:$4 sm:$0xff]   ;;  %v3329_v28 = vld [vmem:[#allocation5 + $0x28] ss:$16 sps:$4 sm:$0xff]  }
  0x4a   :  { %v3330_v29 = vld [vmem:[#allocation5 + $0x4] ss:$16 sps:$4 sm:$0xff]   ;;  %v3332_v30 = vld [vmem:[#allocation5 + $0xc] ss:$16 sps:$4 sm:$0xff]   ;;  %v3334_v31 = vld [vmem:[#allocation5] ss:$16 sps:$4 sm:$0xff]  }
  0x4b   :  { %313 = vmatpush1.bf16.msra.mxu0 %v3304_v11  ;;  %354 = vmatpush1.bf16.msra.mxu1 %v3305_v12  ;;  %v3335_v32 = vld [vmem:[#allocation5 + $0x8] ss:$16 sps:$4 sm:$0xff]   ;;  %v3338_v34 = vld [vmem:[#allocation8 + $0x18c] ss:$28 sps:$4 sm:$0xff]   ;;  %v3350_v43 = vld [vmem:[#allocation8 + $0x11c] ss:$28 sps:$4 sm:$0xff]  }
  0x4c   :  { %314 = vmatprep.subr.bf16.mxu0 %v3306_v13  ;;  %355 = vmatprep.subr.bf16.mxu1 %v3308_v14  ;;  %v3341_v35 = vld [vmem:[#allocation8 + $0x50c] ss:$28 sps:$4 sm:$0xff]   ;;  %v3344_v39 = vld [vmem:[#allocation8 + $0x154] ss:$28 sps:$4 sm:$0xff]   ;;  %v3353_v44 = vld [vmem:[#allocation8 + $0x49c] ss:$28 sps:$4 sm:$0xff]  }
  0x4d   :  { %v3336_v37 = vld [vmem:[#allocation8 + $0x188] ss:$28 sps:$4 sm:$0xff]   ;;  %v3347_v40 = vld [vmem:[#allocation8 + $0x4d4] ss:$28 sps:$4 sm:$0xff]   ;;  %v3354_v49 = vld [vmem:[#allocation8 + $0xe0] ss:$28 sps:$4 sm:$0xff]  }
  0x4e   :  { %v3339_v38 = vld [vmem:[#allocation8 + $0x508] ss:$28 sps:$4 sm:$0xff]   ;;  %v3342_v41 = vld [vmem:[#allocation8 + $0x150] ss:$28 sps:$4 sm:$0xff]   ;;  %v3348_v45 = vld [vmem:[#allocation8 + $0x118] ss:$28 sps:$4 sm:$0xff]  }
  0x4f   :  { %315 = vmatpush1.bf16.msra.mxu0 %v3310_v15  ;;  %356 = vmatpush1.bf16.msra.mxu1 %v3311_v16  ;;  %v3345_v42 = vld [vmem:[#allocation8 + $0x4d0] ss:$28 sps:$4 sm:$0xff]   ;;  %v3351_v46 = vld [vmem:[#allocation8 + $0x498] ss:$28 sps:$4 sm:$0xff]   ;;  %v3356_v47 = vld [vmem:[#allocation8 + $0xe4] ss:$28 sps:$4 sm:$0xff]  }
  0x50   :  { %316 = vmatprep.subr.bf16.mxu0 %v3312_v17  ;;  %357 = vmatprep.subr.bf16.mxu1 %v3314_v18  ;;  %v3359_v48 = vld [vmem:[#allocation8 + $0x464] ss:$28 sps:$4 sm:$0xff]   ;;  %v3362_v51 = vld [vmem:[#allocation8 + $0xac] ss:$28 sps:$4 sm:$0xff]   ;;  %v3368_v55 = vld [vmem:[#allocation8 + $0x74] ss:$28 sps:$4 sm:$0xff]  }
  0x51   :  { %v3357_v50 = vld [vmem:[#allocation8 + $0x460] ss:$28 sps:$4 sm:$0xff]   ;;  %v3365_v52 = vld [vmem:[#allocation8 + $0x42c] ss:$28 sps:$4 sm:$0xff]   ;;  %v3371_v56 = vld [vmem:[#allocation8 + $0x3f4] ss:$28 sps:$4 sm:$0xff]  }
  0x52   :  { %v3360_v53 = vld [vmem:[#allocation8 + $0xa8] ss:$28 sps:$4 sm:$0xff]   ;;  %v3366_v57 = vld [vmem:[#allocation8 + $0x70] ss:$28 sps:$4 sm:$0xff]   ;;  %v3374_v59 = vld [vmem:[#allocation8 + $0x3c] ss:$28 sps:$4 sm:$0xff]  }
  0x53   :  { %317 = vmatpush1.bf16.msra.mxu0 %v3316_v19  ;;  %358 = vmatpush1.bf16.msra.mxu1 %v3317_v20  ;;  %v3363_v54 = vld [vmem:[#allocation8 + $0x428] ss:$28 sps:$4 sm:$0xff]   ;;  %v3369_v58 = vld [vmem:[#allocation8 + $0x3f0] ss:$28 sps:$4 sm:$0xff]   ;;  %v3377_v60 = vld [vmem:[#allocation8 + $0x3bc] ss:$28 sps:$4 sm:$0xff]  }
  0x54   :  { %318 = vmatprep.subr.bf16.mxu0 %v3318_v21  ;;  %359 = vmatprep.subr.bf16.mxu1 %v3320_v22  ;;  %v3372_v61 = vld [vmem:[#allocation8 + $0x38] ss:$28 sps:$4 sm:$0xff]   ;;  %v3380_v63 = vld [vmem:[#allocation8 + $0x4] ss:$28 sps:$4 sm:$0xff]   ;;  %v3386_v3 = vld [vmem:[#allocation8 + $0x34c] ss:$28 sps:$4 sm:$0xff]  }
  0x55   :  { %v3375_v62 = vld [vmem:[#allocation8 + $0x3b8] ss:$28 sps:$4 sm:$0xff]   ;;  %v3383_v0 = vld [vmem:[#allocation8 + $0x384] ss:$28 sps:$4 sm:$0xff]   ;;  %v3389_v4 = vld [vmem:[#allocation8 + $0x6cc] ss:$28 sps:$4 sm:$0xff]  }
  0x56   :  { %v3378_v1 = vld [vmem:[#allocation8] ss:$28 sps:$4 sm:$0xff]   ;;  %v3384_v5 = vld [vmem:[#allocation8 + $0x348] ss:$28 sps:$4 sm:$0xff]   ;;  %v3392_v7 = vld [vmem:[#allocation8 + $0x314] ss:$28 sps:$4 sm:$0xff]  }
  0x57   :  { %319 = vmatpush1.bf16.msra.mxu0 %v3322_v23  ;;  %360 = vmatpush1.bf16.msra.mxu1 %v3323_v24  ;;  %v3381_v2 = vld [vmem:[#allocation8 + $0x380] ss:$28 sps:$4 sm:$0xff]   ;;  %v3387_v6 = vld [vmem:[#allocation8 + $0x6c8] ss:$28 sps:$4 sm:$0xff]   ;;  %v3395_v8 = vld [vmem:[#allocation8 + $0x694] ss:$28 sps:$4 sm:$0xff]  }
  0x58   :  { %320 = vmatprep.subr.bf16.mxu0 %v3324_v25  ;;  %361 = vmatprep.subr.bf16.mxu1 %v3326_v26  ;;  %v3390_v9 = vld [vmem:[#allocation8 + $0x310] ss:$28 sps:$4 sm:$0xff]   ;;  %v3398_v11 = vld [vmem:[#allocation8 + $0x2dc] ss:$28 sps:$4 sm:$0xff]   ;;  %v3404_v15 = vld [vmem:[#allocation8 + $0x2a4] ss:$28 sps:$4 sm:$0xff]  }
  0x59   :  { %v3393_v10 = vld [vmem:[#allocation8 + $0x690] ss:$28 sps:$4 sm:$0xff]   ;;  %v3401_v12 = vld [vmem:[#allocation8 + $0x65c] ss:$28 sps:$4 sm:$0xff]   ;;  %v3407_v16 = vld [vmem:[#allocation8 + $0x624] ss:$28 sps:$4 sm:$0xff]  }
  0x5a   :  { %v3396_v13 = vld [vmem:[#allocation8 + $0x2d8] ss:$28 sps:$4 sm:$0xff]   ;;  %v3402_v17 = vld [vmem:[#allocation8 + $0x2a0] ss:$28 sps:$4 sm:$0xff]   ;;  %v3410_v19 = vld [vmem:[#allocation8 + $0x26c] ss:$28 sps:$4 sm:$0xff]  }
  0x5b   :  { %321 = vmatpush1.bf16.msra.mxu0 %v3328_v27  ;;  %362 = vmatpush1.bf16.msra.mxu1 %v3329_v28  ;;  %v3399_v14 = vld [vmem:[#allocation8 + $0x658] ss:$28 sps:$4 sm:$0xff]   ;;  %v3405_v18 = vld [vmem:[#allocation8 + $0x620] ss:$28 sps:$4 sm:$0xff]   ;;  %v3413_v20 = vld [vmem:[#allocation8 + $0x5ec] ss:$28 sps:$4 sm:$0xff]  }
  0x5c   :  { %322 = vmatprep.subr.bf16.mxu0 %v3330_v29  ;;  %363 = vmatprep.subr.bf16.mxu1 %v3332_v30  ;;  %v3408_v21 = vld [vmem:[#allocation8 + $0x268] ss:$28 sps:$4 sm:$0xff]   ;;  %v3416_v23 = vld [vmem:[#allocation8 + $0x234] ss:$28 sps:$4 sm:$0xff]   ;;  %v3422_v27 = vld [vmem:[#allocation8 + $0x1fc] ss:$28 sps:$4 sm:$0xff]  }
  0x5d   :  { %v3411_v22 = vld [vmem:[#allocation8 + $0x5e8] ss:$28 sps:$4 sm:$0xff]   ;;  %v3419_v24 = vld [vmem:[#allocation8 + $0x5b4] ss:$28 sps:$4 sm:$0xff]   ;;  %v3425_v28 = vld [vmem:[#allocation8 + $0x57c] ss:$28 sps:$4 sm:$0xff]  }
  0x5e   :  { %v3414_v25 = vld [vmem:[#allocation8 + $0x230] ss:$28 sps:$4 sm:$0xff]   ;;  %v3420_v29 = vld [vmem:[#allocation8 + $0x1f8] ss:$28 sps:$4 sm:$0xff]   ;;  %v3426_v33 = vld [vmem:[#allocation8 + $0x1c0] ss:$28 sps:$4 sm:$0xff]  }
  0x5f   :  { %323 = vmatpush1.bf16.msra.mxu0 %v3334_v31  ;;  %364 = vmatpush1.bf16.msra.mxu1 %v3335_v32  ;;  %v3417_v26 = vld [vmem:[#allocation8 + $0x5b0] ss:$28 sps:$4 sm:$0xff]   ;;  %v3423_v30 = vld [vmem:[#allocation8 + $0x578] ss:$28 sps:$4 sm:$0xff]   ;;  %v3428_v31 = vld [vmem:[#allocation8 + $0x1c4] ss:$28 sps:$4 sm:$0xff]  }
  0x60   :  { %1843 = vmatprep.subr.bf16.mxu0 %v3338_v34  ;;  %1884 = vmatprep.subr.bf16.mxu1 %v3341_v35  ;;  %v3431_v32 = vld [vmem:[#allocation8 + $0x544] ss:$28 sps:$4 sm:$0xff]   ;;  %v3434_v35 = vld [vmem:[#allocation8 + $0x194] ss:$28 sps:$4 sm:$0xff]   ;;  %vm3855_vm0 = vmmov 0  }
  0x61   :  { %v3429_v34 = vld [vmem:[#allocation8 + $0x540] ss:$28 sps:$4 sm:$0xff]  }
  0x62   :  { %341 = vmatmul.mubr.bf16.vlgmr.msra.gmra.mxu0 %v93_v36  ;;  %382 = vmatmul.mubr.bf16.vlgmr.msra.gmra.mxu1 %v93_v36  ;;  %v3437_v36 = vld [vmem:[#allocation8 + $0x514] ss:$28 sps:$4 sm:$0xff]  }
  0x63   :  { %1844 = vmatpush1.bf16.msra.mxu0 %v3336_v37  ;;  %1885 = vmatpush1.bf16.msra.mxu1 %v3339_v38  ;;  %v128_v37 = vlaneseq }
  0x64   :  { %1845 = vmatprep.subr.bf16.mxu0 %v3344_v39  ;;  %1886 = vmatprep.subr.bf16.mxu1 %v3347_v40 }
  0x65   :  { %v3913_v38 = vshrl.u32 %v128_v37, 7 }
  0x67   :  { %1846 = vmatpush1.bf16.msra.mxu0 %v3342_v41  ;;  %1887 = vmatpush1.bf16.msra.mxu1 %v3345_v42  ;;  %v130_v39 = vsub.s32 0, %v3913_v38  ;;  %v138_v40 = vsub.s32 2, %v3913_v38  ;;  %v126_v41 = vld [vmem:[#allocation7] sm:$0xf]  ;;  %v134_v42 = vsub.s32 1, %v3913_v38 }
  0x68   :  { %1847 = vmatprep.subr.bf16.mxu0 %v3350_v43  ;;  %1888 = vmatprep.subr.bf16.mxu1 %v3353_v44  ;;  %v142_v43 = vsub.s32 3, %v3913_v38 }
  0x69   :  { %v131_v44 = vrot.slane %v126_v41, %v130_v39 }
  0x6b   :  { %1848 = vmatpush1.bf16.msra.mxu0 %v3348_v45  ;;  %1889 = vmatpush1.bf16.msra.mxu1 %v3351_v46  ;;  %v139_v45 = vrot.slane %v126_v41, %v138_v40  ;;  %v135_v46 = vrot.slane %v126_v41, %v134_v42 }
  0x6c   :  { %1849 = vmatprep.subr.bf16.mxu0 %v3356_v47  ;;  %1890 = vmatprep.subr.bf16.mxu1 %v3359_v48  ;;  %v143_v47 = vrot.slane %v126_v41, %v142_v43  ;;  %v3483_v41 = vld [vmem:[#allocation8 + $0x6d0] ss:$28 sps:$4 sm:$0xff]  }
  0x6f   :  { %1850 = vmatpush1.bf16.msra.mxu0 %v3354_v49  ;;  %1891 = vmatpush1.bf16.msra.mxu1 %v3357_v50 }
  0x70   :  { %1851 = vmatprep.subr.bf16.mxu0 %v3362_v51  ;;  %1892 = vmatprep.subr.bf16.mxu1 %v3365_v52 }
  0x73   :  { %1852 = vmatpush1.bf16.msra.mxu0 %v3360_v53  ;;  %1893 = vmatpush1.bf16.msra.mxu1 %v3363_v54 }
  0x74   :  { %1853 = vmatprep.subr.bf16.mxu0 %v3368_v55  ;;  %1894 = vmatprep.subr.bf16.mxu1 %v3371_v56 }
  0x77   :  { %1854 = vmatpush1.bf16.msra.mxu0 %v3366_v57  ;;  %1895 = vmatpush1.bf16.msra.mxu1 %v3369_v58 }
  0x78   :  { %1855 = vmatprep.subr.bf16.mxu0 %v3374_v59  ;;  %1896 = vmatprep.subr.bf16.mxu1 %v3377_v60 }
  0x7b   :  { %1856 = vmatpush1.bf16.msra.mxu0 %v3372_v61  ;;  %1897 = vmatpush1.bf16.msra.mxu1 %v3375_v62 }
  0x7c   :  { %1857 = vmatprep.subr.bf16.mxu0 %v3380_v63  ;;  %1898 = vmatprep.subr.bf16.mxu1 %v3383_v0 }
  0x7f   :  { %1858 = vmatpush1.bf16.msra.mxu0 %v3378_v1  ;;  %1899 = vmatpush1.bf16.msra.mxu1 %v3381_v2 }
  0x80   :  { %1859 = vmatprep.subr.bf16.mxu0 %v3386_v3  ;;  %1900 = vmatprep.subr.bf16.mxu1 %v3389_v4  ;;  %v3432_v3 = vld [vmem:[#allocation8 + $0x190] ss:$28 sps:$4 sm:$0xff]  }
  0x81   :  { %v3435_v4 = vld [vmem:[#allocation8 + $0x510] ss:$28 sps:$4 sm:$0xff]  }
  0x83   :  { %1860 = vmatpush2.bf16.msra.mxu0 %v3384_v5  ;;  %1901 = vmatpush2.bf16.msra.mxu1 %v3387_v6  ;;  %v3440_v6 = vld [vmem:[#allocation8 + $0x15c] ss:$28 sps:$4 sm:$0xff]  }
  0x84   :  { %1861 = vmatprep.subr.bf16.mxu0 %v3392_v7  ;;  %1902 = vmatprep.subr.bf16.mxu1 %v3395_v8  ;;  %v3443_v7 = vld [vmem:[#allocation8 + $0x4dc] ss:$28 sps:$4 sm:$0xff]  }
  0x85   :  { %v3438_v8 = vld [vmem:[#allocation8 + $0x158] ss:$28 sps:$4 sm:$0xff]  }
  0x87   :  { %1862 = vmatpush2.bf16.msra.mxu0 %v3390_v9  ;;  %1903 = vmatpush2.bf16.msra.mxu1 %v3393_v10  ;;  %v3441_v9 = vld [vmem:[#allocation8 + $0x4d8] ss:$28 sps:$4 sm:$0xff]   ;;  %v3446_v10 = vld [vmem:[#allocation8 + $0x124] ss:$28 sps:$4 sm:$0xff]  }
  0x88   :  { %1863 = vmatprep.subr.bf16.mxu0 %v3398_v11  ;;  %1904 = vmatprep.subr.bf16.mxu1 %v3401_v12  ;;  %v3449_v11 = vld [vmem:[#allocation8 + $0x4a4] ss:$28 sps:$4 sm:$0xff]  }
  0x89   :  { %v3444_v12 = vld [vmem:[#allocation8 + $0x120] ss:$28 sps:$4 sm:$0xff]  }
  0x8b   :  { %1864 = vmatpush2.bf16.msra.mxu0 %v3396_v13  ;;  %1905 = vmatpush2.bf16.msra.mxu1 %v3399_v14  ;;  %v3447_v13 = vld [vmem:[#allocation8 + $0x4a0] ss:$28 sps:$4 sm:$0xff]   ;;  %v3452_v14 = vld [vmem:[#allocation8 + $0xec] ss:$28 sps:$4 sm:$0xff]  }
  0x8c   :  { %1865 = vmatprep.subr.bf16.mxu0 %v3404_v15  ;;  %1906 = vmatprep.subr.bf16.mxu1 %v3407_v16  ;;  %v3455_v15 = vld [vmem:[#allocation8 + $0x46c] ss:$28 sps:$4 sm:$0xff]  }
  0x8d   :  { %v3450_v16 = vld [vmem:[#allocation8 + $0xe8] ss:$28 sps:$4 sm:$0xff]  }
  0x8f   :  { %1866 = vmatpush2.bf16.msra.mxu0 %v3402_v17  ;;  %1907 = vmatpush2.bf16.msra.mxu1 %v3405_v18  ;;  %v3453_v17 = vld [vmem:[#allocation8 + $0x468] ss:$28 sps:$4 sm:$0xff]   ;;  %v3458_v18 = vld [vmem:[#allocation8 + $0xb4] ss:$28 sps:$4 sm:$0xff]  }
  0x90   :  { %1867 = vmatprep.subr.bf16.mxu0 %v3410_v19  ;;  %1908 = vmatprep.subr.bf16.mxu1 %v3413_v20  ;;  %v3461_v19 = vld [vmem:[#allocation8 + $0x434] ss:$28 sps:$4 sm:$0xff]  }
  0x91   :  { %v3456_v20 = vld [vmem:[#allocation8 + $0xb0] ss:$28 sps:$4 sm:$0xff]  }
  0x93   :  { %1868 = vmatpush2.bf16.msra.mxu0 %v3408_v21  ;;  %1909 = vmatpush2.bf16.msra.mxu1 %v3411_v22  ;;  %v3459_v21 = vld [vmem:[#allocation8 + $0x430] ss:$28 sps:$4 sm:$0xff]   ;;  %v3464_v22 = vld [vmem:[#allocation8 + $0x7c] ss:$28 sps:$4 sm:$0xff]  }
  0x94   :  { %1869 = vmatprep.subr.bf16.mxu0 %v3416_v23  ;;  %1910 = vmatprep.subr.bf16.mxu1 %v3419_v24  ;;  %v3467_v23 = vld [vmem:[#allocation8 + $0x3fc] ss:$28 sps:$4 sm:$0xff]  }
  0x95   :  { %v3462_v24 = vld [vmem:[#allocation8 + $0x78] ss:$28 sps:$4 sm:$0xff]  }
  0x97   :  { %1870 = vmatpush2.bf16.msra.mxu0 %v3414_v25  ;;  %1911 = vmatpush2.bf16.msra.mxu1 %v3417_v26  ;;  %v3465_v25 = vld [vmem:[#allocation8 + $0x3f8] ss:$28 sps:$4 sm:$0xff]   ;;  %v3470_v26 = vld [vmem:[#allocation8 + $0x44] ss:$28 sps:$4 sm:$0xff]  }
  0x98   :  { %1871 = vmatprep.subr.bf16.mxu0 %v3422_v27  ;;  %1912 = vmatprep.subr.bf16.mxu1 %v3425_v28  ;;  %v3473_v27 = vld [vmem:[#allocation8 + $0x3c4] ss:$28 sps:$4 sm:$0xff]  }
  0x99   :  { %v3468_v28 = vld [vmem:[#allocation8 + $0x40] ss:$28 sps:$4 sm:$0xff]  }
  0x9b   :  { %1872 = vmatpush2.bf16.msra.mxu0 %v3420_v29  ;;  %1913 = vmatpush2.bf16.msra.mxu1 %v3423_v30  ;;  %v3471_v29 = vld [vmem:[#allocation8 + $0x3c0] ss:$28 sps:$4 sm:$0xff]   ;;  %v3476_v30 = vld [vmem:[#allocation8 + $0xc] ss:$28 sps:$4 sm:$0xff]  }
  0x9c   :  { %1873 = vmatprep.subr.bf16.mxu0 %v3428_v31  ;;  %1914 = vmatprep.subr.bf16.mxu1 %v3431_v32  ;;  %v3479_v31 = vld [vmem:[#allocation8 + $0x38c] ss:$28 sps:$4 sm:$0xff]  }
  0x9d   :  { %v3474_v32 = vld [vmem:[#allocation8 + $0x8] ss:$28 sps:$4 sm:$0xff]  }
  0x9f   :  { %1874 = vmatpush2.bf16.msra.mxu0 %v3426_v33  ;;  %1915 = vmatpush2.bf16.msra.mxu1 %v3429_v34  ;;  %v3477_v33 = vld [vmem:[#allocation8 + $0x388] ss:$28 sps:$4 sm:$0xff]   ;;  %v3482_v34 = vld [vmem:[#allocation8 + $0x354] ss:$28 sps:$4 sm:$0xff]  }
  0xa0   :  { %1925 = vmatprep.subr.bf16.mxu0 %v3434_v35  ;;  %1966 = vmatprep.subr.bf16.mxu1 %v3437_v36  ;;  %v3485_v35 = vld [vmem:[#allocation8 + $0x6d4] ss:$28 sps:$4 sm:$0xff]  }
  0xa1   :  { %v3480_v36 = vld [vmem:[#allocation8 + $0x350] ss:$28 sps:$4 sm:$0xff]  }
 0x122   :  { %v342_v48 = vpop.f32.mrf.mxu0  ;;  %v383_v49 = vpop.f32.mrf.mxu1 }
 0x123   :  { %v343_v50 = vadd.f32 %v342_v48, %v131_v44  ;;  %v384_v51 = vadd.f32 %v383_v49, %v139_v45  ;;  %v3488_v44 = vld [vmem:[#allocation8 + $0x31c] ss:$28 sps:$4 sm:$0xff]   ;;  %v3494_v48 = vld [vmem:[#allocation8 + $0x2e4] ss:$28 sps:$4 sm:$0xff]  }
 0x124   :  { %v344_v52 = vpop.f32.mrf.mxu0  ;;  %v385_v53 = vpop.f32.mrf.mxu1  ;;  %v3491_v45 = vld [vmem:[#allocation8 + $0x69c] ss:$28 sps:$4 sm:$0xff]   ;;  %v3497_v49 = vld [vmem:[#allocation8 + $0x664] ss:$28 sps:$4 sm:$0xff]  }
 0x125   :  { %v392_v54 = vmax.f32 %v384_v51, 0.0  ;;  %v345_v55 = vadd.f32 %v344_v52, %v135_v46  ;;  %v386_v56 = vadd.f32 %v385_v53, %v143_v47  ;;  %v390_v57 = vmax.f32 %v343_v50, 0.0  ;;  %v3486_v46 = vld [vmem:[#allocation8 + $0x318] ss:$28 sps:$4 sm:$0xff]   ;;  %v3492_v50 = vld [vmem:[#allocation8 + $0x2e0] ss:$28 sps:$4 sm:$0xff]  }
 0x126   :  { %v346_v58 = vpop.f32.mrf.mxu0  ;;  %v387_v59 = vpop.f32.mrf.mxu1  ;;  %v3489_v47 = vld [vmem:[#allocation8 + $0x698] ss:$28 sps:$4 sm:$0xff]   ;;  %v3495_v51 = vld [vmem:[#allocation8 + $0x660] ss:$28 sps:$4 sm:$0xff]   ;;  %v3500_v52 = vld [vmem:[#allocation8 + $0x2ac] ss:$28 sps:$4 sm:$0xff]  }
 0x127   :  { %v391_v60 = vmax.f32 %v345_v55, 0.0  ;;  %v393_v61 = vmax.f32 %v386_v56, 0.0  ;;  %v3927_v62 = vpack.c.bf16 %v392_v54, %v392_v54  ;;  %v3933_v5 = vpack.c.bf16 %v390_v57, %v390_v57  ;;  %v3503_v53 = vld [vmem:[#allocation8 + $0x62c] ss:$28 sps:$4 sm:$0xff]   ;;  %v3506_v56 = vld [vmem:[#allocation8 + $0x274] ss:$28 sps:$4 sm:$0xff]  }
 0x128   :  { %v347_v63 = vpop.f32.mrf.mxu0  ;;  %v388_v0 = vpop.f32.mrf.mxu1  ;;  %v3498_v54 = vld [vmem:[#allocation8 + $0x2a8] ss:$28 sps:$4 sm:$0xff]   ;;  %v3509_v57 = vld [vmem:[#allocation8 + $0x5f4] ss:$28 sps:$4 sm:$0xff]  }
 0x129   :  { %v3929_v1 = vpack.c.bf16 %v391_v60, %v391_v60  ;;  %v3931_v2 = vpack.c.bf16 %v393_v61, %v393_v61  ;;  %v3501_v55 = vld [vmem:[#allocation8 + $0x628] ss:$28 sps:$4 sm:$0xff]   ;;  %v3504_v58 = vld [vmem:[#allocation8 + $0x270] ss:$28 sps:$4 sm:$0xff]   ;;  %v3512_v60 = vld [vmem:[#allocation8 + $0x23c] ss:$28 sps:$4 sm:$0xff]  }
 0x12a   :  { %v3507_v59 = vld [vmem:[#allocation8 + $0x5f0] ss:$28 sps:$4 sm:$0xff]   ;;  %v3515_v61 = vld [vmem:[#allocation8 + $0x5bc] ss:$28 sps:$4 sm:$0xff]  }
 0x12b   :  { %1875 = vmatprep.mubr.bf16.mxu0 %v3929_v1  ;;  %1916 = vmatprep.mubr.bf16.mxu1 %v3931_v2  ;;  %v3510_v63 = vld [vmem:[#allocation8 + $0x238] ss:$28 sps:$4 sm:$0xff]  }
 0x12c   :  { %1876 = vmatmul.mubr.bf16.vlgmr.msra.gmra.mxu0 %v3933_v5  ;;  %1917 = vmatmul.mubr.bf16.vlgmr.msra.gmra.mxu1 %v3927_v62  ;;  %v3513_v0 = vld [vmem:[#allocation8 + $0x5b8] ss:$28 sps:$4 sm:$0xff]  }
 0x12d   :  { %1926 = vmatpush1.bf16.msra.mxu0 %v3432_v3  ;;  %1967 = vmatpush1.bf16.msra.mxu1 %v3435_v4  ;;  %v3518_v3 = vld [vmem:[#allocation8 + $0x204] ss:$28 sps:$4 sm:$0xff]  }
 0x12e   :  { %1957 = vmatprep.mubr.bf16.mxu0 %v3929_v1  ;;  %1998 = vmatprep.mubr.bf16.mxu1 %v3931_v2  ;;  %v3521_v4 = vld [vmem:[#allocation8 + $0x584] ss:$28 sps:$4 sm:$0xff]  }
 0x12f   :  { %1927 = vmatprep.subr.bf16.mxu0 %v3440_v6  ;;  %1968 = vmatprep.subr.bf16.mxu1 %v3443_v7  ;;  %v3516_v6 = vld [vmem:[#allocation8 + $0x200] ss:$28 sps:$4 sm:$0xff]  }
 0x130   :  { %v3519_v7 = vld [vmem:[#allocation8 + $0x580] ss:$28 sps:$4 sm:$0xff]  }
 0x131   :  { %1928 = vmatpush1.bf16.msra.mxu0 %v3438_v8  ;;  %1969 = vmatpush1.bf16.msra.mxu1 %v3441_v9  ;;  %v3524_v8 = vld [vmem:[#allocation8 + $0x1cc] ss:$28 sps:$4 sm:$0xff]  }
 0x132   :  { %1929 = vmatprep.subr.bf16.mxu0 %v3446_v10  ;;  %1970 = vmatprep.subr.bf16.mxu1 %v3449_v11  ;;  %v3527_v9 = vld [vmem:[#allocation8 + $0x54c] ss:$28 sps:$4 sm:$0xff]  }
 0x133   :  { %v3522_v10 = vld [vmem:[#allocation8 + $0x1c8] ss:$28 sps:$4 sm:$0xff]  }
 0x134   :  { %v3525_v11 = vld [vmem:[#allocation8 + $0x548] ss:$28 sps:$4 sm:$0xff]  }
 0x135   :  { %1930 = vmatpush1.bf16.msra.mxu0 %v3444_v12  ;;  %1971 = vmatpush1.bf16.msra.mxu1 %v3447_v13  ;;  %v3530_v12 = vld [vmem:[#allocation8 + $0x19c] ss:$28 sps:$4 sm:$0xff]  }
 0x136   :  { %1931 = vmatprep.subr.bf16.mxu0 %v3452_v14  ;;  %1972 = vmatprep.subr.bf16.mxu1 %v3455_v15  ;;  %v3533_v13 = vld [vmem:[#allocation8 + $0x51c] ss:$28 sps:$4 sm:$0xff]  }
 0x137   :  { %v3528_v14 = vld [vmem:[#allocation8 + $0x198] ss:$28 sps:$4 sm:$0xff]  }
 0x138   :  { %v3531_v15 = vld [vmem:[#allocation8 + $0x518] ss:$28 sps:$4 sm:$0xff]  }
 0x139   :  { %1932 = vmatpush1.bf16.msra.mxu0 %v3450_v16  ;;  %1973 = vmatpush1.bf16.msra.mxu1 %v3453_v17  ;;  %v3536_v16 = vld [vmem:[#allocation8 + $0x164] ss:$28 sps:$4 sm:$0xff]  }
 0x13a   :  { %1933 = vmatprep.subr.bf16.mxu0 %v3458_v18  ;;  %1974 = vmatprep.subr.bf16.mxu1 %v3461_v19  ;;  %v3539_v17 = vld [vmem:[#allocation8 + $0x4e4] ss:$28 sps:$4 sm:$0xff]  }
 0x13b   :  { %v3534_v18 = vld [vmem:[#allocation8 + $0x160] ss:$28 sps:$4 sm:$0xff]  }
 0x13c   :  { %v3537_v19 = vld [vmem:[#allocation8 + $0x4e0] ss:$28 sps:$4 sm:$0xff]  }
 0x13d   :  { %1934 = vmatpush1.bf16.msra.mxu0 %v3456_v20  ;;  %1975 = vmatpush1.bf16.msra.mxu1 %v3459_v21  ;;  %v3542_v20 = vld [vmem:[#allocation8 + $0x12c] ss:$28 sps:$4 sm:$0xff]  }
 0x13e   :  { %1935 = vmatprep.subr.bf16.mxu0 %v3464_v22  ;;  %1976 = vmatprep.subr.bf16.mxu1 %v3467_v23  ;;  %v3545_v21 = vld [vmem:[#allocation8 + $0x4ac] ss:$28 sps:$4 sm:$0xff]  }
 0x13f   :  { %v3540_v22 = vld [vmem:[#allocation8 + $0x128] ss:$28 sps:$4 sm:$0xff]  }
 0x140   :  { %v3543_v23 = vld [vmem:[#allocation8 + $0x4a8] ss:$28 sps:$4 sm:$0xff]  }
 0x141   :  { %1936 = vmatpush1.bf16.msra.mxu0 %v3462_v24  ;;  %1977 = vmatpush1.bf16.msra.mxu1 %v3465_v25  ;;  %v3548_v24 = vld [vmem:[#allocation8 + $0xf4] ss:$28 sps:$4 sm:$0xff]  }
 0x142   :  { %1937 = vmatprep.subr.bf16.mxu0 %v3470_v26  ;;  %1978 = vmatprep.subr.bf16.mxu1 %v3473_v27  ;;  %v3551_v25 = vld [vmem:[#allocation8 + $0x474] ss:$28 sps:$4 sm:$0xff]  }
 0x143   :  { %v3546_v26 = vld [vmem:[#allocation8 + $0xf0] ss:$28 sps:$4 sm:$0xff]  }
 0x144   :  { %v3549_v27 = vld [vmem:[#allocation8 + $0x470] ss:$28 sps:$4 sm:$0xff]  }
 0x145   :  { %1938 = vmatpush1.bf16.msra.mxu0 %v3468_v28  ;;  %1979 = vmatpush1.bf16.msra.mxu1 %v3471_v29  ;;  %v3554_v28 = vld [vmem:[#allocation8 + $0xbc] ss:$28 sps:$4 sm:$0xff]  }
 0x146   :  { %1939 = vmatprep.subr.bf16.mxu0 %v3476_v30  ;;  %1980 = vmatprep.subr.bf16.mxu1 %v3479_v31  ;;  %v3557_v29 = vld [vmem:[#allocation8 + $0x43c] ss:$28 sps:$4 sm:$0xff]  }
 0x147   :  { %v3552_v30 = vld [vmem:[#allocation8 + $0xb8] ss:$28 sps:$4 sm:$0xff]  }
 0x148   :  { %v3555_v31 = vld [vmem:[#allocation8 + $0x438] ss:$28 sps:$4 sm:$0xff]  }
 0x149   :  { %1940 = vmatpush1.bf16.msra.mxu0 %v3474_v32  ;;  %1981 = vmatpush1.bf16.msra.mxu1 %v3477_v33  ;;  %v3560_v32 = vld [vmem:[#allocation8 + $0x84] ss:$28 sps:$4 sm:$0xff]  }
 0x14a   :  { %1941 = vmatprep.subr.bf16.mxu0 %v3482_v34  ;;  %1982 = vmatprep.subr.bf16.mxu1 %v3485_v35  ;;  %v3563_v33 = vld [vmem:[#allocation8 + $0x404] ss:$28 sps:$4 sm:$0xff]  }
 0x14b   :  { %v3558_v34 = vld [vmem:[#allocation8 + $0x80] ss:$28 sps:$4 sm:$0xff]  }
 0x14c   :  { %v3561_v35 = vld [vmem:[#allocation8 + $0x400] ss:$28 sps:$4 sm:$0xff]  }
 0x14d   :  { %1942 = vmatpush2.bf16.msra.mxu0 %v3480_v36  ;;  %1983 = vmatpush2.bf16.msra.mxu1 %v3483_v41  ;;  %v3566_v36 = vld [vmem:[#allocation8 + $0x4c] ss:$28 sps:$4 sm:$0xff]  }
 0x14e   :  { %1943 = vmatprep.subr.bf16.mxu0 %v3488_v44  ;;  %1984 = vmatprep.subr.bf16.mxu1 %v3491_v45  ;;  %v3569_v41 = vld [vmem:[#allocation8 + $0x3cc] ss:$28 sps:$4 sm:$0xff]  }
 0x14f   :  { %v3564_v44 = vld [vmem:[#allocation8 + $0x48] ss:$28 sps:$4 sm:$0xff]  }
 0x150   :  { %v3567_v45 = vld [vmem:[#allocation8 + $0x3c8] ss:$28 sps:$4 sm:$0xff]  }
 0x151   :  { %1944 = vmatpush2.bf16.msra.mxu0 %v3486_v46  ;;  %1985 = vmatpush2.bf16.msra.mxu1 %v3489_v47  ;;  %v3572_v46 = vld [vmem:[#allocation8 + $0x14] ss:$28 sps:$4 sm:$0xff]  }
 0x152   :  { %1945 = vmatprep.subr.bf16.mxu0 %v3494_v48  ;;  %1986 = vmatprep.subr.bf16.mxu1 %v3497_v49  ;;  %v3575_v47 = vld [vmem:[#allocation8 + $0x394] ss:$28 sps:$4 sm:$0xff]  }
 0x153   :  { %v3570_v48 = vld [vmem:[#allocation8 + $0x10] ss:$28 sps:$4 sm:$0xff]  }
 0x154   :  { %v3573_v49 = vld [vmem:[#allocation8 + $0x390] ss:$28 sps:$4 sm:$0xff]  }
 0x155   :  { %1946 = vmatpush2.bf16.msra.mxu0 %v3492_v50  ;;  %1987 = vmatpush2.bf16.msra.mxu1 %v3495_v51  ;;  %v3578_v50 = vld [vmem:[#allocation8 + $0x35c] ss:$28 sps:$4 sm:$0xff]  }
 0x156   :  { %1947 = vmatprep.subr.bf16.mxu0 %v3500_v52  ;;  %1988 = vmatprep.subr.bf16.mxu1 %v3503_v53  ;;  %v3581_v51 = vld [vmem:[#allocation8 + $0x6dc] ss:$28 sps:$4 sm:$0xff]  }
 0x157   :  { %v3576_v52 = vld [vmem:[#allocation8 + $0x358] ss:$28 sps:$4 sm:$0xff]  }
 0x158   :  { %v3579_v53 = vld [vmem:[#allocation8 + $0x6d8] ss:$28 sps:$4 sm:$0xff]  }
 0x159   :  { %1948 = vmatpush2.bf16.msra.mxu0 %v3498_v54  ;;  %1989 = vmatpush2.bf16.msra.mxu1 %v3501_v55  ;;  %v3584_v54 = vld [vmem:[#allocation8 + $0x324] ss:$28 sps:$4 sm:$0xff]  }
 0x15a   :  { %1949 = vmatprep.subr.bf16.mxu0 %v3506_v56  ;;  %1990 = vmatprep.subr.bf16.mxu1 %v3509_v57  ;;  %v3587_v55 = vld [vmem:[#allocation8 + $0x6a4] ss:$28 sps:$4 sm:$0xff]  }
 0x15b   :  { %v3582_v56 = vld [vmem:[#allocation8 + $0x320] ss:$28 sps:$4 sm:$0xff]  }
 0x15c   :  { %v3585_v57 = vld [vmem:[#allocation8 + $0x6a0] ss:$28 sps:$4 sm:$0xff]  }
 0x15d   :  { %1950 = vmatpush2.bf16.msra.mxu0 %v3504_v58  ;;  %1991 = vmatpush2.bf16.msra.mxu1 %v3507_v59  ;;  %v3590_v58 = vld [vmem:[#allocation8 + $0x2ec] ss:$28 sps:$4 sm:$0xff]  }
 0x15e   :  { %1951 = vmatprep.subr.bf16.mxu0 %v3512_v60  ;;  %1992 = vmatprep.subr.bf16.mxu1 %v3515_v61  ;;  %v3593_v59 = vld [vmem:[#allocation8 + $0x66c] ss:$28 sps:$4 sm:$0xff]  }
 0x15f   :  { %v3588_v60 = vld [vmem:[#allocation8 + $0x2e8] ss:$28 sps:$4 sm:$0xff]  }
 0x160   :  { %v3591_v61 = vld [vmem:[#allocation8 + $0x668] ss:$28 sps:$4 sm:$0xff]  }
 0x161   :  { %1952 = vmatpush2.bf16.msra.mxu0 %v3510_v63  ;;  %1993 = vmatpush2.bf16.msra.mxu1 %v3513_v0  ;;  %v3596_v63 = vld [vmem:[#allocation8 + $0x2b4] ss:$28 sps:$4 sm:$0xff]  }
 0x162   :  { %1953 = vmatprep.subr.bf16.mxu0 %v3518_v3  ;;  %1994 = vmatprep.subr.bf16.mxu1 %v3521_v4  ;;  %v3599_v0 = vld [vmem:[#allocation8 + $0x634] ss:$28 sps:$4 sm:$0xff]  }
 0x163   :  { %v3594_v3 = vld [vmem:[#allocation8 + $0x2b0] ss:$28 sps:$4 sm:$0xff]  }
 0x164   :  { %v3597_v4 = vld [vmem:[#allocation8 + $0x630] ss:$28 sps:$4 sm:$0xff]  }
 0x165   :  { %1954 = vmatpush2.bf16.msra.mxu0 %v3516_v6  ;;  %1995 = vmatpush2.bf16.msra.mxu1 %v3519_v7  ;;  %v3602_v6 = vld [vmem:[#allocation8 + $0x27c] ss:$28 sps:$4 sm:$0xff]  }
 0x166   :  { %1955 = vmatprep.subr.bf16.mxu0 %v3524_v8  ;;  %1996 = vmatprep.subr.bf16.mxu1 %v3527_v9  ;;  %v3605_v7 = vld [vmem:[#allocation8 + $0x5fc] ss:$28 sps:$4 sm:$0xff]  }
 0x167   :  { %v3600_v8 = vld [vmem:[#allocation8 + $0x278] ss:$28 sps:$4 sm:$0xff]  }
 0x168   :  { %v3603_v9 = vld [vmem:[#allocation8 + $0x5f8] ss:$28 sps:$4 sm:$0xff]  }
 0x169   :  { %1956 = vmatpush2.bf16.msra.mxu0 %v3522_v10  ;;  %1997 = vmatpush2.bf16.msra.mxu1 %v3525_v11  ;;  %v3608_v10 = vld [vmem:[#allocation8 + $0x244] ss:$28 sps:$4 sm:$0xff]  }
 0x16a   :  { %2007 = vmatprep.subr.bf16.mxu0 %v3530_v12  ;;  %2048 = vmatprep.subr.bf16.mxu1 %v3533_v13  ;;  %v3611_v11 = vld [vmem:[#allocation8 + $0x5c4] ss:$28 sps:$4 sm:$0xff]  }
 0x16b   :  { %v3606_v12 = vld [vmem:[#allocation8 + $0x240] ss:$28 sps:$4 sm:$0xff]  }
 0x16c   :  { %1958 = vmatmul.mubr.bf16.vlgmr.msra.gmra.mxu0 %v3933_v5  ;;  %1999 = vmatmul.mubr.bf16.vlgmr.msra.gmra.mxu1 %v3927_v62  ;;  %v3609_v13 = vld [vmem:[#allocation8 + $0x5c0] ss:$28 sps:$4 sm:$0xff]  }
 0x16d   :  { %2008 = vmatpush1.bf16.msra.mxu0 %v3528_v14  ;;  %2039 = vmatprep.mubr.bf16.mxu0 %v3929_v1  ;;  %v3614_v14 = vld [vmem:[#allocation8 + $0x20c] ss:$28 sps:$4 sm:$0xff]  }
 0x16e   :  { %2049 = vmatpush1.bf16.msra.mxu1 %v3531_v15  ;;  %2080 = vmatprep.mubr.bf16.mxu1 %v3931_v2  ;;  %v3617_v15 = vld [vmem:[#allocation8 + $0x58c] ss:$28 sps:$4 sm:$0xff]  }
 0x16f   :  { %2009 = vmatprep.subr.bf16.mxu0 %v3536_v16  ;;  %2050 = vmatprep.subr.bf16.mxu1 %v3539_v17  ;;  %v3612_v16 = vld [vmem:[#allocation8 + $0x208] ss:$28 sps:$4 sm:$0xff]  }
 0x170   :  { %v3615_v17 = vld [vmem:[#allocation8 + $0x588] ss:$28 sps:$4 sm:$0xff]  }
 0x171   :  { %2010 = vmatpush1.bf16.msra.mxu0 %v3534_v18  ;;  %v3620_v18 = vld [vmem:[#allocation8 + $0x1d4] ss:$28 sps:$4 sm:$0xff]  }
 0x172   :  { %2051 = vmatpush1.bf16.msra.mxu1 %v3537_v19  ;;  %2011 = vmatprep.subr.bf16.mxu0 %v3542_v20  ;;  %v3623_v19 = vld [vmem:[#allocation8 + $0x554] ss:$28 sps:$4 sm:$0xff]  }
 0x173   :  { %2052 = vmatprep.subr.bf16.mxu1 %v3545_v21  ;;  %v3618_v20 = vld [vmem:[#allocation8 + $0x1d0] ss:$28 sps:$4 sm:$0xff]  }
 0x174   :  { %v3621_v21 = vld [vmem:[#allocation8 + $0x550] ss:$28 sps:$4 sm:$0xff]  }
 0x175   :  { %2012 = vmatpush1.bf16.msra.mxu0 %v3540_v22  ;;  %v3624_v22 = vld [vmem:[#allocation8 + $0x360] ss:$28 sps:$4 sm:$0xff]  }
 0x176   :  { %2053 = vmatpush1.bf16.msra.mxu1 %v3543_v23  ;;  %2013 = vmatprep.subr.bf16.mxu0 %v3548_v24  ;;  %v3625_v23 = vld [vmem:[#allocation8 + $0x6e0] ss:$28 sps:$4 sm:$0xff]  }
 0x177   :  { %2054 = vmatprep.subr.bf16.mxu1 %v3551_v25  ;;  %v3626_v24 = vld [vmem:[#allocation8 + $0x1a0] ss:$28 sps:$4 sm:$0xff]  }
 0x178   :  { %v3627_v25 = vld [vmem:[#allocation8 + $0x520] ss:$28 sps:$4 sm:$0xff]  }
 0x179   :  { %2014 = vmatpush1.bf16.msra.mxu0 %v3546_v26  ;;  %v3628_v26 = vld [vmem:[#allocation8 + $0x328] ss:$28 sps:$4 sm:$0xff]  }
 0x17a   :  { %2055 = vmatpush1.bf16.msra.mxu1 %v3549_v27  ;;  %2015 = vmatprep.subr.bf16.mxu0 %v3554_v28  ;;  %v3629_v27 = vld [vmem:[#allocation8 + $0x6a8] ss:$28 sps:$4 sm:$0xff]  }
 0x17b   :  { %2056 = vmatprep.subr.bf16.mxu1 %v3557_v29  ;;  %v3630_v28 = vld [vmem:[#allocation8 + $0x168] ss:$28 sps:$4 sm:$0xff]  }
 0x17c   :  { %v3631_v29 = vld [vmem:[#allocation8 + $0x4e8] ss:$28 sps:$4 sm:$0xff]  }
 0x17d   :  { %2016 = vmatpush1.bf16.msra.mxu0 %v3552_v30  ;;  %v3632_v30 = vld [vmem:[#allocation8 + $0x2f0] ss:$28 sps:$4 sm:$0xff]  }
 0x17e   :  { %2057 = vmatpush1.bf16.msra.mxu1 %v3555_v31  ;;  %2017 = vmatprep.subr.bf16.mxu0 %v3560_v32  ;;  %v3633_v31 = vld [vmem:[#allocation8 + $0x670] ss:$28 sps:$4 sm:$0xff]  }
 0x17f   :  { %2058 = vmatprep.subr.bf16.mxu1 %v3563_v33  ;;  %v3634_v32 = vld [vmem:[#allocation8 + $0x130] ss:$28 sps:$4 sm:$0xff]  }
 0x180   :  { %v3635_v33 = vld [vmem:[#allocation8 + $0x4b0] ss:$28 sps:$4 sm:$0xff]  }
 0x181   :  { %2018 = vmatpush1.bf16.msra.mxu0 %v3558_v34  ;;  %v3636_v34 = vld [vmem:[#allocation8 + $0x2b8] ss:$28 sps:$4 sm:$0xff]  }
 0x182   :  { %2059 = vmatpush1.bf16.msra.mxu1 %v3561_v35  ;;  %2019 = vmatprep.subr.bf16.mxu0 %v3566_v36  ;;  %v3637_v35 = vld [vmem:[#allocation8 + $0x638] ss:$28 sps:$4 sm:$0xff]  }
 0x183   :  { %2060 = vmatprep.subr.bf16.mxu1 %v3569_v41  ;;  %v3638_v36 = vld [vmem:[#allocation8 + $0xf8] ss:$28 sps:$4 sm:$0xff]   ;;  %v3640_v41 = vld [vmem:[#allocation8 + $0x280] ss:$28 sps:$4 sm:$0xff]  }
 0x185   :  { %2020 = vmatpush1.bf16.msra.mxu0 %v3564_v44  ;;  %v3641_v44 = vld [vmem:[#allocation8 + $0x600] ss:$28 sps:$4 sm:$0xff]  }
 0x186   :  { %2061 = vmatpush1.bf16.msra.mxu1 %v3567_v45  ;;  %2021 = vmatprep.subr.bf16.mxu0 %v3572_v46  ;;  %v3643_v45 = vld [vmem:[#allocation8 + $0x440] ss:$28 sps:$4 sm:$0xff]   ;;  %v3644_v46 = vld [vmem:[#allocation8 + $0x248] ss:$28 sps:$4 sm:$0xff]  }
 0x187   :  { %2062 = vmatprep.subr.bf16.mxu1 %v3575_v47  ;;  %v3645_v47 = vld [vmem:[#allocation8 + $0x5c8] ss:$28 sps:$4 sm:$0xff]  }
 0x189   :  { %2022 = vmatpush1.bf16.msra.mxu0 %v3570_v48  ;;  %v3646_v48 = vld [vmem:[#allocation8 + $0x88] ss:$28 sps:$4 sm:$0xff]  }
 0x18a   :  { %2063 = vmatpush1.bf16.msra.mxu1 %v3573_v49  ;;  %2023 = vmatprep.subr.bf16.mxu0 %v3578_v50  ;;  %v3647_v49 = vld [vmem:[#allocation8 + $0x408] ss:$28 sps:$4 sm:$0xff]   ;;  %v3648_v50 = vld [vmem:[#allocation8 + $0x210] ss:$28 sps:$4 sm:$0xff]  }
 0x18b   :  { %2064 = vmatprep.subr.bf16.mxu1 %v3581_v51  ;;  %v3649_v51 = vld [vmem:[#allocation8 + $0x590] ss:$28 sps:$4 sm:$0xff]  }
 0x18d   :  { %2024 = vmatpush2.bf16.msra.mxu0 %v3576_v52  ;;  %v3650_v52 = vld [vmem:[#allocation8 + $0x50] ss:$28 sps:$4 sm:$0xff]  }
 0x18e   :  { %2065 = vmatpush2.bf16.msra.mxu1 %v3579_v53  ;;  %2025 = vmatprep.subr.bf16.mxu0 %v3584_v54  ;;  %v3651_v53 = vld [vmem:[#allocation8 + $0x3d0] ss:$28 sps:$4 sm:$0xff]   ;;  %v3652_v54 = vld [vmem:[#allocation8 + $0x1d8] ss:$28 sps:$4 sm:$0xff]  }
 0x18f   :  { %2066 = vmatprep.subr.bf16.mxu1 %v3587_v55  ;;  %v3653_v55 = vld [vmem:[#allocation8 + $0x558] ss:$28 sps:$4 sm:$0xff]  }
 0x191   :  { %2026 = vmatpush2.bf16.msra.mxu0 %v3582_v56  ;;  %v3654_v56 = vld [vmem:[#allocation8 + $0x18] ss:$28 sps:$4 sm:$0xff]  }
 0x192   :  { %2067 = vmatpush2.bf16.msra.mxu1 %v3585_v57  ;;  %2027 = vmatprep.subr.bf16.mxu0 %v3590_v58  ;;  %v3655_v57 = vld [vmem:[#allocation8 + $0x398] ss:$28 sps:$4 sm:$0xff]  }
 0x193   :  { %2068 = vmatprep.subr.bf16.mxu1 %v3593_v59  ;;  %v3656_v58 = vld [vmem:[#allocation10 + $0x78] sm:$0xff]  }
 0x194   :  { %v3672_v59 = vld [vmem:[#allocation10 + $0xf8] sm:$0xff]  }
 0x195   :  { %2028 = vmatpush2.bf16.msra.mxu0 %v3588_v60  ;;  %v3657_v60 = vld [vmem:[#allocation10 + $0x38] sm:$0xff]  }
 0x196   :  { %2069 = vmatpush2.bf16.msra.mxu1 %v3591_v61  ;;  %2029 = vmatprep.subr.bf16.mxu0 %v3596_v63  ;;  %v3658_v61 = vld [vmem:[#allocation10 + $0x70] sm:$0xff]   ;;  %v3673_v63 = vld [vmem:[#allocation10 + $0xb8] sm:$0xff]  }
 0x197   :  { %2070 = vmatprep.subr.bf16.mxu1 %v3599_v0  ;;  %v3674_v0 = vld [vmem:[#allocation10 + $0xf0] sm:$0xff]  }
 0x199   :  { %2030 = vmatpush2.bf16.msra.mxu0 %v3594_v3  ;;  %v3659_v3 = vld [vmem:[#allocation10 + $0x30] sm:$0xff]  }
 0x19a   :  { %2071 = vmatpush2.bf16.msra.mxu1 %v3597_v4  ;;  %2031 = vmatprep.subr.bf16.mxu0 %v3602_v6  ;;  %v3660_v4 = vld [vmem:[#allocation10 + $0x68] sm:$0xff]   ;;  %v3675_v6 = vld [vmem:[#allocation10 + $0xb0] sm:$0xff]  }
 0x19b   :  { %2072 = vmatprep.subr.bf16.mxu1 %v3605_v7  ;;  %v3676_v7 = vld [vmem:[#allocation10 + $0xe8] sm:$0xff]  }
 0x19d   :  { %2032 = vmatpush2.bf16.msra.mxu0 %v3600_v8  ;;  %v3661_v8 = vld [vmem:[#allocation10 + $0x28] sm:$0xff]  }
 0x19e   :  { %2073 = vmatpush2.bf16.msra.mxu1 %v3603_v9  ;;  %2033 = vmatprep.subr.bf16.mxu0 %v3608_v10  ;;  %v3662_v9 = vld [vmem:[#allocation10 + $0x60] sm:$0xff]   ;;  %v3677_v10 = vld [vmem:[#allocation10 + $0xa8] sm:$0xff]  }
 0x19f   :  { %2074 = vmatprep.subr.bf16.mxu1 %v3611_v11  ;;  %v3678_v11 = vld [vmem:[#allocation10 + $0xe0] sm:$0xff]  }
 0x1a1   :  { %2034 = vmatpush2.bf16.msra.mxu0 %v3606_v12  ;;  %v3679_v12 = vld [vmem:[#allocation10 + $0xa0] sm:$0xff]  }
 0x1a2   :  { %2075 = vmatpush2.bf16.msra.mxu1 %v3609_v13  ;;  %2035 = vmatprep.subr.bf16.mxu0 %v3614_v14  ;;  %v3680_v13 = vld [vmem:[#allocation10 + $0xd8] sm:$0xff]  }
 0x1a3   :  { %2076 = vmatprep.subr.bf16.mxu1 %v3617_v15  ;;  %v3665_v14 = vld [vmem:[#allocation10 + $0x18] sm:$0xff]   ;;  %v3666_v15 = vld [vmem:[#allocation10 + $0x50] sm:$0xff]  }
 0x1a5   :  { %2036 = vmatpush2.bf16.msra.mxu0 %v3612_v16  ;;  %v3681_v16 = vld [vmem:[#allocation10 + $0x98] sm:$0xff]  }
 0x1a6   :  { %2077 = vmatpush2.bf16.msra.mxu1 %v3615_v17  ;;  %2037 = vmatprep.subr.bf16.mxu0 %v3620_v18  ;;  %v3682_v17 = vld [vmem:[#allocation10 + $0xd0] sm:$0xff]  }
 0x1a7   :  { %2078 = vmatprep.subr.bf16.mxu1 %v3623_v19  ;;  %v3667_v18 = vld [vmem:[#allocation10 + $0x10] sm:$0xff]   ;;  %v3668_v19 = vld [vmem:[#allocation10 + $0x48] sm:$0xff]  }
 0x1a9   :  { %2038 = vmatpush2.bf16.msra.mxu0 %v3618_v20  ;;  %v3683_v20 = vld [vmem:[#allocation10 + $0x90] sm:$0xff]  }
 0x1aa   :  { %2079 = vmatpush2.bf16.msra.mxu1 %v3621_v21  ;;  %3134 = vmatprep.subr.bf16.mxu0 %v3624_v22  ;;  %v3684_v21 = vld [vmem:[#allocation10 + $0xc8] sm:$0xff]  }
 0x1ab   :  { %3156 = vmatprep.subr.bf16.mxu1 %v3625_v23  ;;  %v3669_v22 = vld [vmem:[#allocation10 + $0x8] sm:$0xff]   ;;  %v3670_v23 = vld [vmem:[#allocation10 + $0x40] sm:$0xff]  }
 0x1ac   :  { %2040 = vmatmul.mubr.bf16.vlgmr.msra.gmra.mxu0 %v3933_v5 }
 0x1ad   :  { %2081 = vmatmul.mubr.bf16.vlgmr.msra.gmra.mxu1 %v3927_v62  ;;  %3135 = vmatpush3.bf16.msra.mxu0 %v3626_v24  ;;  %v3685_v24 = vld [vmem:[#allocation10 + $0x88] sm:$0xff]  }
 0x1ae   :  { %2121 = vmatprep.mubr.bf16.mxu0 %v3929_v1  ;;  %3157 = vmatpush3.bf16.msra.mxu1 %v3627_v25  ;;  %v3639_v1 = vld [vmem:[#allocation8 + $0x478] ss:$28 sps:$4 sm:$0xff]   ;;  %v3686_v25 = vld [vmem:[#allocation10 + $0xc0] sm:$0xff]  }
 0x1af   :  { %2161 = vmatprep.mubr.bf16.mxu1 %v3931_v2  ;;  %3136 = vmatprep.subr.bf16.mxu0 %v3628_v26  ;;  %v3642_v2 = vld [vmem:[#allocation8 + $0xc0] ss:$28 sps:$4 sm:$0xff]  }
 0x1b0   :  { %3158 = vmatprep.subr.bf16.mxu1 %v3629_v27  ;;  %v3671_v26 = vld [vmem:[#allocation10] sm:$0xff]   ;;  %v3954_v27 = vld [vmem:[%s3994_s4] sm:$0xff] }
 0x1b1   :  { %3137 = vmatpush3.bf16.msra.mxu0 %v3630_v28  ;;  %v3687_v28 = vld [vmem:[#allocation10 + $0x80] sm:$0xff]  }
 0x1b2   :  { %3159 = vmatpush3.bf16.msra.mxu1 %v3631_v29  ;;  %3138 = vmatprep.subr.bf16.mxu0 %v3632_v30  ;;  %v3688_v29 = vld [vmem:[#allocation10 + $0x178] sm:$0xff]   ;;  %v659_v30 = vrot.slane %v3954_v27, %v130_v39 }
 0x1b3   :  { %3160 = vmatprep.subr.bf16.mxu1 %v3633_v31  ;;  %v663_v31 = vrot.slane %v3954_v27, %v134_v42  ;;  %v3691_v42 = vld [vmem:[#allocation10 + $0x130] sm:$0xff]  }
 0x1b5   :  { %3139 = vmatpush3.bf16.msra.mxu0 %v3634_v32 }
 0x1b6   :  { %3161 = vmatpush3.bf16.msra.mxu1 %v3635_v33  ;;  %3140 = vmatprep.subr.bf16.mxu0 %v3636_v34 }
 0x1b7   :  { %3162 = vmatprep.subr.bf16.mxu1 %v3637_v35 }
 0x1b9   :  { %3141 = vmatpush3.bf16.msra.mxu0 %v3638_v36 }
 0x1ba   :  { %3163 = vmatpush3.bf16.msra.mxu1 %v3639_v1  ;;  %3142 = vmatprep.subr.bf16.mxu0 %v3640_v41 }
 0x1bb   :  { %3164 = vmatprep.subr.bf16.mxu1 %v3641_v44 }
 0x1bd   :  { %3143 = vmatpush3.bf16.msra.mxu0 %v3642_v2 }
 0x1be   :  { %3165 = vmatpush3.bf16.msra.mxu1 %v3643_v45  ;;  %3144 = vmatprep.subr.bf16.mxu0 %v3644_v46 }
 0x1bf   :  { %3166 = vmatprep.subr.bf16.mxu1 %v3645_v47 }
 0x1c1   :  { %3145 = vmatpush3.bf16.msra.mxu0 %v3646_v48 }
 0x1c2   :  { %3167 = vmatpush3.bf16.msra.mxu1 %v3647_v49  ;;  %3146 = vmatprep.subr.bf16.mxu0 %v3648_v50  ;;  %v3689_v50 = vld [vmem:[#allocation10 + $0x138] sm:$0xff]  }
 0x1c3   :  { %3168 = vmatprep.subr.bf16.mxu1 %v3649_v51 }
 0x1c5   :  { %3147 = vmatpush3.bf16.msra.mxu0 %v3650_v52  ;;  %v3690_v52 = vld [vmem:[#allocation10 + $0x170] sm:$0xff]  }
 0x1c6   :  { %3169 = vmatpush3.bf16.msra.mxu1 %v3651_v53  ;;  %3148 = vmatprep.subr.bf16.mxu0 %v3652_v54  ;;  %v3854_v53 = vmov 0.0   ;;  %v3692_v54 = vld [vmem:[#allocation10 + $0x168] sm:$0xff]  }
 0x1c7   :  { %3170 = vmatprep.subr.bf16.mxu1 %v3653_v55  ;;  %v3693_v55 = vld [vmem:[#allocation10 + $0x128] sm:$0xff]  }
 0x1c9   :  { %3149 = vmatpush3.bf16.msra.mxu0 %v3654_v56  ;;  %v3694_v56 = vld [vmem:[#allocation10 + $0x160] sm:$0xff]  }
 0x1ca   :  { %3171 = vmatpush3.bf16.msra.mxu1 %v3655_v57  ;;  %3178 = vmatprep.subr.bf16.mxu0 %v3656_v58  ;;  %v3695_v57 = vld [vmem:[#allocation10 + $0x120] sm:$0xff]   ;;  %v3696_v58 = vld [vmem:[#allocation10 + $0x158] sm:$0xff]  }
 0x1cb   :  { %3200 = vmatprep.subr.bf16.mxu1 %v3672_v59  ;;  %v3697_v59 = vld [vmem:[#allocation10 + $0x118] sm:$0xff]  }
 0x1cc   :  { %2122 = vmatmul.mubr.bf16.vlgmr.msra.gmra.mxu0 %v3933_v5  ;;  %v3663_v5 = vld [vmem:[#allocation10 + $0x20] sm:$0xff]  }
 0x1cd   :  { %2162 = vmatmul.mubr.bf16.vlgmr.msra.gmra.mxu1 %v3927_v62  ;;  %3179 = vmatpush3.bf16.msra.mxu0 %v3657_v60  ;;  %v3664_v62 = vld [vmem:[#allocation10 + $0x58] sm:$0xff]   ;;  %v3698_v60 = vld [vmem:[#allocation10 + $0x150] sm:$0xff]  }
 0x1ce   :  { %3180 = vmatprep.subr.bf16.mxu0 %v3658_v61  ;;  %3201 = vmatpush3.bf16.msra.mxu1 %v3673_v63  ;;  %v3699_v61 = vld [vmem:[#allocation10 + $0x110] sm:$0xff]   ;;  %v3700_v63 = vld [vmem:[#allocation10 + $0x148] sm:$0xff]  }
 0x1cf   :  { %3202 = vmatprep.subr.bf16.mxu1 %v3674_v0  ;;  %v3701_v0 = vld [vmem:[#allocation10 + $0x108] sm:$0xff]  }
 0x1d1   :  { %3181 = vmatpush3.bf16.msra.mxu0 %v3659_v3  ;;  %v3702_v3 = vld [vmem:[#allocation10 + $0x140] sm:$0xff]  }
 0x1d2   :  { %3182 = vmatprep.subr.bf16.mxu0 %v3660_v4  ;;  %3203 = vmatpush3.bf16.msra.mxu1 %v3675_v6  ;;  %v3703_v4 = vld [vmem:[#allocation10 + $0x100] sm:$0xff]   ;;  %v667_v6 = vrot.slane %v3954_v27, %v138_v40  ;;  %v3704_v40 = vld [vmem:[#allocation10 + $0x1b8] sm:$0xff]  }
 0x1d3   :  { %3204 = vmatprep.subr.bf16.mxu1 %v3676_v7  ;;  %v671_v7 = vrot.slane %v3954_v27, %v142_v43  ;;  %v3705_v43 = vld [vmem:[#allocation10 + $0x1b0] sm:$0xff]  }
 0x1d5   :  { %3183 = vmatpush3.bf16.msra.mxu0 %v3661_v8 }
 0x1d6   :  { %3184 = vmatprep.subr.bf16.mxu0 %v3662_v9  ;;  %3205 = vmatpush3.bf16.msra.mxu1 %v3677_v10 }
 0x1d7   :  { %3206 = vmatprep.subr.bf16.mxu1 %v3678_v11 }
 0x1d9   :  { %3185 = vmatpush3.bf16.msra.mxu0 %v3663_v5 }
 0x1da   :  { %3186 = vmatprep.subr.bf16.mxu0 %v3664_v62  ;;  %3207 = vmatpush3.bf16.msra.mxu1 %v3679_v12 }
 0x1db   :  { %3208 = vmatprep.subr.bf16.mxu1 %v3680_v13 }
 0x1dd   :  { %3187 = vmatpush3.bf16.msra.mxu0 %v3665_v14 }
 0x1de   :  { %3188 = vmatprep.subr.bf16.mxu0 %v3666_v15  ;;  %3209 = vmatpush3.bf16.msra.mxu1 %v3681_v16 }
 0x1df   :  { %3210 = vmatprep.subr.bf16.mxu1 %v3682_v17 }
 0x1e1   :  { %3189 = vmatpush3.bf16.msra.mxu0 %v3667_v18 }
 0x1e2   :  { %3190 = vmatprep.subr.bf16.mxu0 %v3668_v19  ;;  %3211 = vmatpush3.bf16.msra.mxu1 %v3683_v20 }
 0x1e3   :  { %3212 = vmatprep.subr.bf16.mxu1 %v3684_v21 }
 0x1e5   :  { %3191 = vmatpush3.bf16.msra.mxu0 %v3669_v22  ;;  %v3706_v22 = vld [vmem:[#allocation10 + $0x1a8] sm:$0xff]  }
 0x1e6   :  { %3192 = vmatprep.subr.bf16.mxu0 %v3670_v23  ;;  %3213 = vmatpush3.bf16.msra.mxu1 %v3685_v24  ;;  %v3707_v23 = vld [vmem:[#allocation10 + $0x1a0] sm:$0xff]   ;;  %v3708_v24 = vld [vmem:[#allocation10 + $0x198] sm:$0xff]  }
 0x1e7   :  { %3214 = vmatprep.subr.bf16.mxu1 %v3686_v25  ;;  %v3709_v25 = vld [vmem:[#allocation10 + $0x190] sm:$0xff]  }
 0x1e9   :  { %3193 = vmatpush3.bf16.msra.mxu0 %v3671_v26  ;;  %v3710_v26 = vld [vmem:[#allocation10 + $0x188] sm:$0xff]  }
 0x1ea   :  { %3215 = vmatpush3.bf16.msra.mxu1 %v3687_v28  ;;  %3222 = vmatprep.subr.bf16.mxu0 %v3688_v29  ;;  %v3711_v28 = vld [vmem:[#allocation10 + $0x180] sm:$0xff]   ;;  %v674_v29 = vsub.s32 4, %v3913_v38 }
 0x1eb   :  { %3253 = vmatprep.subr.bf16.mxu1 %v3854_v53 }
 0x1ec   :  { %v1877_v32 = vpop.f32.mrf.mxu0  ;;  %v1918_v33 = vpop.f32.mrf.mxu1 }
 0x1ed   :  { %v1878_v34 = vadd.f32 %v1877_v32, %v659_v30  ;;  %v678_v30 = vsub.s32 5, %v3913_v38 }
 0x1ee   :  { %v1879_v35 = vpop.f32.mrf.mxu0  ;;  %v1920_v36 = vpop.f32.mrf.mxu1 }
 0x1ef   :  { %v1919_v1 = vadd.f32 %v1918_v33, %v1878_v34  ;;  %v1880_v41 = vadd.f32 %v1879_v35, %v663_v31  ;;  %v675_v31 = vrot.slane %v3954_v27, %v674_v29  ;;  %v679_v32 = vrot.slane %v3954_v27, %v678_v30 }
 0x1f0   :  { %v1881_v44 = vpop.f32.mrf.mxu0  ;;  %v1922_v2 = vpop.f32.mrf.mxu1 }
 0x1f1   :  { %v1921_v45 = vadd.f32 %v1920_v36, %v1880_v41  ;;  %v2169_v46 = vmax.f32 %v1919_v1, 0.0 }
 0x1f2   :  { %v1882_v47 = vpop.f32.mrf.mxu0  ;;  %v1923_v39 = vpop.f32.mrf.mxu1 }
 0x1f3   :  { %v2170_v48 = vmax.f32 %v1921_v45, 0.0  ;;  %v2176_v51 = vpack.c.bf16 %v2169_v46, %v2169_v46 }
 0x1f5   :  { %v2177_v49 = vpack.c.bf16 %v2170_v48, %v2170_v48 }
 0x1f7   :  { %2670 = vmatprep.mubr.bf16.mxu0 %v2177_v49 }
 0x1f8   :  { %2671 = vmatmul.mubr.bf16.vlgmr.msra.gmra.mxu0 %v2176_v51 }
 0x1f9   :  { %3223 = vmatpush3.bf16.msra.mxu0 %v3689_v50 }
 0x1fa   :  { %3224 = vmatprep.subr.bf16.mxu0 %v3690_v52  ;;  %v682_v52 = vsub.s32 6, %v3913_v38 }
 0x1fd   :  { %3225 = vmatpush3.bf16.msra.mxu0 %v3691_v42 }
 0x1fe   :  { %3226 = vmatprep.subr.bf16.mxu0 %v3692_v54  ;;  %v683_v54 = vrot.slane %v3954_v27, %v682_v52  ;;  %v3077_v27 = vld [vmem:[%s3996_s6] ss:$0 sm:$0xff]  ;;  %s3856_s6 = smov [#allocation11]  }
 0x1ff   :  { %s2810_s30 = sshll.u32 %s3856_s6, 4  ;;  %s2811_s30 = int_to_ptr.vmem [resolvable:$true] %s2810_s30 }
 0x200   :  { %s3814_s8 = scalar_lea.vmem %s2811_s30, 128  ;;  %p3819_p12 = scmp.lt.s32.totalorder %s2811_s30, %s2811_s30 }
 0x201   :  { %3227 = vmatpush3.bf16.msra.mxu0 %v3693_v55  ;;  %p3815_p11 = scmp.ne.s32.totalorder %s2811_s30, %s3814_s8  ;;  %p3820_p13 = scmp.lt.s32.totalorder %s3814_s8, %s3814_s8 }
 0x202   :  { %3228 = vmatprep.subr.bf16.mxu0 %v3694_v56 }
 0x203   :  { %p3821_p0 = por %p3820_p13, %p3819_p12 }
 0x205   :  { %3229 = vmatpush3.bf16.msra.mxu0 %v3695_v57  ;;  %p3822_p1 = pnand %p3821_p0, %p3815_p11 }
 0x206   :  { %3230 = vmatprep.subr.bf16.mxu0 %v3696_v58 }
 0x209   :  { %3231 = vmatpush3.bf16.msra.mxu0 %v3697_v59 }
 0x20a   :  { %3232 = vmatprep.subr.bf16.mxu0 %v3698_v60 }
 0x20d   :  { %3233 = vmatpush3.bf16.msra.mxu0 %v3699_v61 }
 0x20e   :  { %3234 = vmatprep.subr.bf16.mxu0 %v3700_v63 }
 0x211   :  { %3235 = vmatpush3.bf16.msra.mxu0 %v3701_v0 }
 0x212   :  { %3236 = vmatprep.subr.bf16.mxu0 %v3702_v3 }
 0x215   :  { %3237 = vmatpush3.bf16.msra.mxu0 %v3703_v4 }
 0x22c   :  { %v1959_v8 = vpop.f32.mrf.mxu0  ;;  %v2000_v9 = vpop.f32.mrf.mxu1 }
 0x22d   :  { %v1960_v10 = vadd.f32 %v1959_v8, %v667_v6 }
 0x22e   :  { %v1961_v11 = vpop.f32.mrf.mxu0  ;;  %v2002_v5 = vpop.f32.mrf.mxu1 }
 0x22f   :  { %v2001_v62 = vadd.f32 %v2000_v9, %v1960_v10  ;;  %v1962_v12 = vadd.f32 %v1961_v11, %v671_v7 }
 0x230   :  { %v1963_v13 = vpop.f32.mrf.mxu0  ;;  %v2004_v14 = vpop.f32.mrf.mxu1 }
 0x231   :  { %v2003_v15 = vadd.f32 %v2002_v5, %v1962_v12  ;;  %v2171_v16 = vmax.f32 %v2001_v62, 0.0 }
 0x232   :  { %v1964_v17 = vpop.f32.mrf.mxu0  ;;  %v2005_v18 = vpop.f32.mrf.mxu1 }
 0x233   :  { %v2172_v19 = vmax.f32 %v2003_v15, 0.0  ;;  %v2178_v21 = vpack.c.bf16 %v2171_v16, %v2171_v16 }
 0x235   :  { %v2179_v20 = vpack.c.bf16 %v2172_v19, %v2172_v19 }
 0x237   :  { %2710 = vmatprep.mubr.bf16.mxu1 %v2179_v20 }
 0x238   :  { %2711 = vmatmul.mubr.bf16.vlgmr.msra.gmra.mxu1 %v2178_v21 }
 0x239   :  { %3254 = vmatpush3.bf16.msra.mxu1 %v3704_v40  ;;  %3269 = vmatprep.mubr.msk.bf16.mxu1 %vm3855_vm0, %v3854_v53 }
 0x23a   :  { %3255 = vmatprep.subr.bf16.mxu1 %v3854_v53 }
 0x23d   :  { %3256 = vmatpush3.bf16.msra.mxu1 %v3705_v43 }
 0x23e   :  { %3257 = vmatprep.subr.bf16.mxu1 %v3854_v53 }
 0x241   :  { %3258 = vmatpush3.bf16.msra.mxu1 %v3706_v22 }
 0x242   :  { %3259 = vmatprep.subr.bf16.mxu1 %v3854_v53 }
 0x245   :  { %3260 = vmatpush3.bf16.msra.mxu1 %v3707_v23 }
 0x246   :  { %3261 = vmatprep.subr.bf16.mxu1 %v3854_v53 }
 0x249   :  { %3262 = vmatpush3.bf16.msra.mxu1 %v3708_v24 }
 0x24a   :  { %3263 = vmatprep.subr.bf16.mxu1 %v3854_v53 }
 0x24d   :  { %3264 = vmatpush3.bf16.msra.mxu1 %v3709_v25  ;;  %v2799_v25 = vand.u32 127, %v128_v37 }
 0x24e   :  { %3265 = vmatprep.subr.bf16.mxu1 %v3854_v53 }
 0x24f   :  { %vm2800_vm1 = vcmp.eq.s32.totalorder %v2799_v25, 7 }
 0x251   :  { %3266 = vmatpush3.bf16.msra.mxu1 %v3710_v26 }
 0x252   :  { %3267 = vmatprep.subr.bf16.mxu1 %v3854_v53 }
 0x255   :  { %3268 = vmatpush3.bf16.msra.mxu1 %v3711_v28 }
 0x26c   :  { %v2041_v33 = vpop.f32.mrf.mxu0 }
 0x26d   :  { %v2042_v34 = vadd.f32 %v2041_v33, %v675_v31  ;;  %v2082_v35 = vpop.f32.mrf.mxu1 }
 0x26e   :  { %v2043_v36 = vpop.f32.mrf.mxu0 }
 0x26f   :  { %v2083_v1 = vadd.f32 %v2082_v35, %v2042_v34  ;;  %v2044_v41 = vadd.f32 %v2043_v36, %v679_v32  ;;  %v2084_v44 = vpop.f32.mrf.mxu1 }
 0x270   :  { %v2045_v2 = vpop.f32.mrf.mxu0 }
 0x271   :  { %v2085_v45 = vadd.f32 %v2084_v44, %v2044_v41  ;;  %v2086_v46 = vpop.f32.mrf.mxu1  ;;  %v2173_v47 = vmax.f32 %v2083_v1, 0.0 }
 0x272   :  { %v2046_v39 = vpop.f32.mrf.mxu0 }
 0x273   :  { %v2174_v48 = vmax.f32 %v2085_v45, 0.0  ;;  %v2087_v49 = vpop.f32.mrf.mxu1  ;;  %v2180_v51 = vpack.c.bf16 %v2173_v47, %v2173_v47 }
 0x275   :  { %v2181_v50 = vpack.c.bf16 %v2174_v48, %v2174_v48 }
 0x277   :  { %2750 = vmatprep.mubr.bf16.mxu0 %v2181_v50 }
 0x278   :  { %2751 = vmatmul.mubr.bf16.vlgmr.msra.gmra.mxu0 %v2180_v51 }
 0x28c   :  { %v3150_v42 = vpop.f32.mrf.mxu0 }
 0x28d   :  { %v3172_v53 = vpop.f32.mrf.mxu1 }
 0x28e   :  { %v3151_v55 = vpop.f32.mrf.mxu0 }
 0x28f   :  { %v3152_v56 = vadd.f32 %v3151_v55, %v3150_v42  ;;  %v3173_v57 = vpop.f32.mrf.mxu1 }
 0x290   :  { %v3153_v58 = vpop.f32.mrf.mxu0  ;;  %v3174_v60 = vadd.f32 %v3173_v57, %v3172_v53 }
 0x291   :  { %v2124_v59 = vadd.f32 %v3152_v56, %v683_v54  ;;  %v3175_v61 = vpop.f32.mrf.mxu1 }
 0x292   :  { %v3154_v63 = vpop.f32.mrf.mxu0 }
 0x293   :  { %v2164_v0 = vadd.f32 %v3174_v60, %v2124_v59  ;;  %v3176_v3 = vpop.f32.mrf.mxu1 }
 0x295   :  { %v2175_v4 = vmax.f32 %v2164_v0, 0.0 }
 0x297   :  { %v2182_v6 = vpack.c.bf16 %v2175_v4, %v2175_v4 }
 0x299   :  { %3270 = vmatmul.mubr.bf16.vlgmr.msra.gmra.mxu1 %v2182_v6 }
 0x2b8   :  { %v3194_v7 = vpop.f32.mrf.mxu0 }
 0x2ba   :  { %v3195_v8 = vpop.f32.mrf.mxu0 }
 0x2bb   :  { %v3196_v38 = vadd.f32 %v3195_v8, %v3194_v7 }
 0x2bc   :  { %v3197_v9 = vpop.f32.mrf.mxu0 }
 0x2bd   :  { %v2673_v62 = vadd.f32 %v3196_v38, %v3077_v27 }
 0x2be   :  { %v3198_v10 = vpop.f32.mrf.mxu0 }
 0x2f8   :  { %v3216_v11 = vpop.f32.mrf.mxu1 }
 0x2fa   :  { %v3217_v5 = vpop.f32.mrf.mxu1 }
 0x2fb   :  { %v3218_v12 = vadd.f32 %v3217_v5, %v3216_v11 }
 0x2fc   :  { %v3219_v13 = vpop.f32.mrf.mxu1 }
 0x2fd   :  { %v2713_v14 = vadd.f32 %v3218_v12, %v2673_v62 }
 0x2fe   :  { %v3220_v15 = vpop.f32.mrf.mxu1 }
 0x338   :  { %v3238_v16 = vpop.f32.mrf.mxu0 }
 0x33a   :  { %v3239_v17 = vpop.f32.mrf.mxu0 }
 0x33b   :  { %v3240_v20 = vadd.f32 %v3239_v17, %v3238_v16 }
 0x33c   :  { %v3241_v18 = vpop.f32.mrf.mxu0 }
 0x33d   :  { %v2753_v40 = vadd.f32 %v3240_v20, %v2713_v14 }
 0x33e   :  { %v3242_v19 = vpop.f32.mrf.mxu0 }
 0x359   :  { %v2792_v21 = vpop.f32.mrf.mxu1 }
 0x35a   :  { %v2793_v43 = vadd.f32 %v2792_v21, %v2753_v40 }
 0x35b   :  { %v3271_v22 = vpop.f32.mrf.mxu1 }
 0x35c   :  { %3712 = vtanh.f32 %v2793_v43 }
 0x35d   :  { %v2795_v23 = vpop.f32.mrf.mxu1 }
 0x35f   :  { %v3272_v24 = vpop.f32.mrf.mxu1 }
 0x369   :  { %v3713_v26 = vpop.eup %3712 }
 0x36a   :  { %v2802_v28 = vsel %vm2800_vm1, %v3713_v26, %v2793_v43 }
 0x36b   :  { %2803 = vst [vmem:[#allocation11] sm:$0xff] %v2802_v28 }
 0x36c   :  { %3825 = shalt.err (!%p3822_p1)
}
 0x36d   :  { %2813 = dma.vmem_to_hbm [thread:$0]  %s2811_s30, 128, %s3997_s7, [#allocation4]  }
 0x36e   :  { %3840 = dma.done.wait [#allocation4], 128  }
 0x36f   :  { %3841 = vsyncadd [#allocation4], 4294967168 }
 0x370   :  { %2817 = vsyncpa [#allocation3], 1 }
 0x371   :  { %2818 = vsyncpa [#allocation6], 1 }
 0x372   :  { %2819 = vsyncpa [#allocation9], 1 }
 0x373   :  { %2820 = vsyncpa [#allocation4], 1 }

</bundles_post_ra>
